<compile_context>
chip_gen: v5e
topology: v5e:2x2
jax: 0.10.0
libtpu: 0.0.40
codegen_flags: <defaults>
</compile_context>

<pallas_src>
import functools

import jax
import jax.numpy as jnp
from jax import lax
from jax.experimental import pallas as pl
from jax.experimental.pallas import tpu as pltpu


def _convlstm_cell_kernel(patches_ref, c_ref, w_ref, b_ref,
                          h_out_ref, c_out_ref, *, Chid):
    """One ConvLSTM cell update for one batch element.

    patches_ref : (1, k*k*Ct, HW)  im2col patches of concat([x, h_cur])
    c_ref       : (1, Chid, HW)    current cell state
    w_ref       : (4*Chid, k*k*Ct) conv weight as a matmul matrix
    b_ref       : (4*Chid, 1)      conv bias (per output channel)
    h_out_ref   : (1, Chid, HW)    next hidden state
    c_out_ref   : (1, Chid, HW)    next cell state
    """
    p = patches_ref[0]                       # (K2C, HW)
    c_cur = c_ref[0]                         # (Chid, HW)

    # Single MXU matmul: (4*Chid, K2C) @ (K2C, HW) -> (4*Chid, HW), lane-dense.
    gates = jnp.dot(w_ref[...], p, preferred_element_type=jnp.float32)
    gates = gates + b_ref[...]               # bias lane-broadcast (4*Chid, 1)

    # torch.split order: i, f, o, g (each Chid output channels).
    i = jax.nn.sigmoid(gates[0 * Chid:1 * Chid, :])
    f = jax.nn.sigmoid(gates[1 * Chid:2 * Chid, :])
    o = jax.nn.sigmoid(gates[2 * Chid:3 * Chid, :])
    g = jnp.tanh(gates[3 * Chid:4 * Chid, :])

    c_next = f * c_cur + i * g
    h_next = o * jnp.tanh(c_next)

    h_out_ref[0] = h_next
    c_out_ref[0] = c_next


def convlstm_cell_pallas(w2d, bias2d, x, h, c, *, kernel_size):
    """PhyD_ConvLSTM_Cell.forward.

    x : (B, Cin, H, W) float32      (NCHW, like PyTorch)
    h : (B, Chid, H, W) float32     current hidden state
    c : (B, Chid, H, W) float32     current cell state
    w2d : (4*Chid, k*k*(Cin+Chid))  conv weight reshaped for the matmul,
          column index = (dy*k + dx)*(Cin+Chid) + in_channel
    bias2d : (4*Chid, 1)
    Returns (h_next, c_next), each (B, Chid, H, W) float32.
    """
    B, Cin, H, W = x.shape
    Chid = h.shape[1]
    Ct = Cin + Chid
    k = kernel_size
    pad = k // 2
    HW = H * W
    K2C = k * k * Ct

    # --- wrapper-side im2col (layout glue; data is tiny) --------------------
    comb = jnp.concatenate([x, h], axis=1)                      # (B, Ct, H, W)
    combp = jnp.pad(comb, ((0, 0), (0, 0), (pad, pad), (pad, pad)))
    patches = jnp.concatenate(
        [combp[:, :, dy:dy + H, dx:dx + W] for dy in range(k) for dx in range(k)],
        axis=1)                                                 # (B, k*k*Ct, H, W)
    patches = patches.reshape(B, K2C, HW)                       # lanes = HW
    c_flat = c.reshape(B, Chid, HW)

    kern = functools.partial(_convlstm_cell_kernel, Chid=Chid)

    h_next, c_next = pl.pallas_call(
        kern,
        out_shape=(jax.ShapeDtypeStruct((B, Chid, HW), jnp.float32),
                   jax.ShapeDtypeStruct((B, Chid, HW), jnp.float32)),
        grid=(B,),
        in_specs=[
            pl.BlockSpec((1, K2C, HW), lambda b: (b, 0, 0)),
            pl.BlockSpec((1, Chid, HW), lambda b: (b, 0, 0)),
            pl.BlockSpec((4 * Chid, K2C), lambda b: (0, 0)),
            pl.BlockSpec((4 * Chid, 1), lambda b: (0, 0)),
        ],
        out_specs=(pl.BlockSpec((1, Chid, HW), lambda b: (b, 0, 0)),
                   pl.BlockSpec((1, Chid, HW), lambda b: (b, 0, 0))),
        compiler_params=pltpu.CompilerParams(
            dimension_semantics=("parallel",)),
    )(patches, c_flat, w2d, bias2d)

    return h_next.reshape(B, Chid, H, W), c_next.reshape(B, Chid, H, W)


def convlstm_cell_ref(w_oihw, bias, x, h, c):
    """Pure-JAX reference of PhyD_ConvLSTM_Cell.forward (NCHW, f32-exact conv)."""
    dn = ('NCHW', 'OIHW', 'NCHW')
    comb = jnp.concatenate([x, h], axis=1)
    cc = lax.conv_general_dilated(comb, w_oihw, (1, 1), 'SAME',
                                  dimension_numbers=dn,
                                  precision=lax.Precision.HIGHEST)
    cc = cc + bias.reshape(1, -1, 1, 1)
    cc_i, cc_f, cc_o, cc_g = jnp.split(cc, 4, axis=1)
    i = jax.nn.sigmoid(cc_i)
    f = jax.nn.sigmoid(cc_f)
    o = jax.nn.sigmoid(cc_o)
    g = jnp.tanh(cc_g)
    c_next = f * c + i * g
    h_next = o * jnp.tanh(c_next)
    return h_next, c_next


if __name__ == "__main__":
    # Shapes consistent with the module: input_shape=(16,16), input_dim=4,
    # hidden_dim=32, kernel_size=(3,3), batch=2, short 3-step recurrence.
    B, Cin, H, W = 2, 4, 16, 16
    Chid = 32
    k = 3
    seq = 3
    Ct = Cin + Chid

    root = jax.random.PRNGKey(0)
    kw, kb, kx = jax.random.split(root, 3)

    # PyTorch Conv2d weight layout: (out_c=4*Chid, in_c=Ct, kh, kw).
    w_oihw = jax.random.normal(kw, (4 * Chid, Ct, k, k), jnp.float32) * 0.05
    bias = jax.random.normal(kb, (4 * Chid,), jnp.float32) * 0.1

    # Matmul-form weight: column index = (dy*k + dx)*Ct + ic.
    w2d = jnp.transpose(w_oihw, (0, 2, 3, 1)).reshape(4 * Chid, k * k * Ct)
    bias2d = bias.reshape(4 * Chid, 1)

    x_seq = jax.random.normal(kx, (seq, B, Cin, H, W), jnp.float32)

    h0 = jnp.zeros((B, Chid, H, W), jnp.float32)
    c0 = jnp.zeros((B, Chid, H, W), jnp.float32)

    cell_fwd = jax.jit(functools.partial(convlstm_cell_pallas, kernel_size=k))
    cell_ref = jax.jit(convlstm_cell_ref)

    h, c = h0, c0
    h_r, c_r = h0, c0
    for t in range(seq):
        h, c = cell_fwd(w2d, bias2d, x_seq[t], h, c)
        h_r, c_r = cell_ref(w_oihw, bias, x_seq[t], h_r, c_r)

    h = jax.block_until_ready(h)
    c = jax.block_until_ready(c)

    err_h = float(jnp.max(jnp.abs(h - h_r)))
    err_c = float(jnp.max(jnp.abs(c - c_r)))
    # Kernel uses default (fast bf16-pass) MXU precision vs. an f32 reference.
    assert err_h < 3e-2, f"h_next max abs err {err_h}"
    assert err_c < 3e-2, f"c_next max abs err {err_c}"

    print("KERNEL_OK")
</pallas_src>

<mosaic_0001>
module attributes {stable_mosaic.version = 11 : i64} {
  func.func @_convlstm_cell_kernel(%arg0: i32, %arg1: memref<1x324x256xf32, #tpu.memory_space<vmem>>, %arg2: memref<1x32x256xf32, #tpu.memory_space<vmem>>, %arg3: memref<128x324xf32, #tpu.memory_space<vmem>>, %arg4: memref<128x1xf32, #tpu.memory_space<vmem>>, %arg5: memref<1x32x256xf32, #tpu.memory_space<vmem>>, %arg6: memref<1x32x256xf32, #tpu.memory_space<vmem>>) attributes {dimension_semantics = [#tpu.dimension_semantics<parallel>], iteration_bounds = array<i64: 2>, scalar_prefetch = 0 : i64, scratch_operands = 0 : i64, tpu.core_type = #tpu.core_type<tc>, window_params = [{transform_indices = @transform_0, window_bounds = array<i64: 1, 324, 256>}, {transform_indices = @transform_1, window_bounds = array<i64: 1, 32, 256>}, {pipeline_mode = #tpu.pipeline_mode<synchronous>, transform_indices = @transform_2, window_bounds = array<i64: 128, 324>}, {pipeline_mode = #tpu.pipeline_mode<synchronous>, transform_indices = @transform_3, window_bounds = array<i64: 128, 1>}, {transform_indices = @transform_4, window_bounds = array<i64: 1, 32, 256>}, {transform_indices = @transform_5, window_bounds = array<i64: 1, 32, 256>}]} {
    %c0 = arith.constant 0 : index
    %c0_0 = arith.constant 0 : index
    %c0_1 = arith.constant 0 : index
    %0 = vector.load %arg1[%c0, %c0_0, %c0_1] : memref<1x324x256xf32, #tpu.memory_space<vmem>>, vector<1x324x256xf32>
    %1 = vector.shape_cast %0 : vector<1x324x256xf32> to vector<324x256xf32>
    %c0_2 = arith.constant 0 : index
    %c0_3 = arith.constant 0 : index
    %c0_4 = arith.constant 0 : index
    %2 = vector.load %arg2[%c0_2, %c0_3, %c0_4] : memref<1x32x256xf32, #tpu.memory_space<vmem>>, vector<1x32x256xf32>
    %3 = vector.shape_cast %2 : vector<1x32x256xf32> to vector<32x256xf32>
    %c0_5 = arith.constant 0 : index
    %c0_6 = arith.constant 0 : index
    %4 = vector.load %arg3[%c0_5, %c0_6] : memref<128x324xf32, #tpu.memory_space<vmem>>, vector<128x324xf32>
    %cst = arith.constant dense<0.000000e+00> : vector<128x256xf32>
    %5 = tpu.matmul %4, %1, %cst {dimension_numbers = #tpu.dot_dimension_numbers<[1], [0], [0], [1], [0, 0, 1, 1], [], []>} : vector<128x324xf32>, vector<324x256xf32>, vector<128x256xf32> -> vector<128x256xf32>
    %c0_7 = arith.constant 0 : index
    %c0_8 = arith.constant 0 : index
    %6 = vector.load %arg4[%c0_7, %c0_8] : memref<128x1xf32, #tpu.memory_space<vmem>>, vector<128x1xf32>
    %7 = vector.broadcast %6 : vector<128x1xf32> to vector<128x256xf32>
    %8 = arith.addf %5, %7 : vector<128x256xf32>
    %9 = vector.extract_strided_slice %8 {offsets = [0, 0], sizes = [32, 256], strides = [1, 1]} : vector<128x256xf32> to vector<32x256xf32>
    %10 = arith.negf %9 : vector<32x256xf32>
    %11 = math.exp %10 : vector<32x256xf32>
    %cst_9 = arith.constant 1.000000e+00 : f32
    %12 = vector.broadcast %cst_9 : f32 to vector<32x256xf32>
    %13 = arith.addf %12, %11 : vector<32x256xf32>
    %14 = arith.divf %12, %13 : vector<32x256xf32>
    %15 = vector.extract_strided_slice %8 {offsets = [32, 0], sizes = [32, 256], strides = [1, 1]} : vector<128x256xf32> to vector<32x256xf32>
    %16 = arith.negf %15 : vector<32x256xf32>
    %17 = math.exp %16 : vector<32x256xf32>
    %cst_10 = arith.constant 1.000000e+00 : f32
    %18 = vector.broadcast %cst_10 : f32 to vector<32x256xf32>
    %19 = arith.addf %18, %17 : vector<32x256xf32>
    %20 = arith.divf %18, %19 : vector<32x256xf32>
    %21 = vector.extract_strided_slice %8 {offsets = [64, 0], sizes = [32, 256], strides = [1, 1]} : vector<128x256xf32> to vector<32x256xf32>
    %22 = arith.negf %21 : vector<32x256xf32>
    %23 = math.exp %22 : vector<32x256xf32>
    %cst_11 = arith.constant 1.000000e+00 : f32
    %24 = vector.broadcast %cst_11 : f32 to vector<32x256xf32>
    %25 = arith.addf %24, %23 : vector<32x256xf32>
    %26 = arith.divf %24, %25 : vector<32x256xf32>
    %27 = vector.extract_strided_slice %8 {offsets = [96, 0], sizes = [32, 256], strides = [1, 1]} : vector<128x256xf32> to vector<32x256xf32>
    %28 = math.tanh %27 : vector<32x256xf32>
    %29 = arith.mulf %20, %3 : vector<32x256xf32>
    %30 = arith.mulf %14, %28 : vector<32x256xf32>
    %31 = arith.addf %29, %30 : vector<32x256xf32>
    %32 = math.tanh %31 : vector<32x256xf32>
    %33 = arith.mulf %26, %32 : vector<32x256xf32>
    %c0_12 = arith.constant 0 : index
    %c0_13 = arith.constant 0 : index
    %c0_14 = arith.constant 0 : index
    %34 = vector.load %arg5[%c0_12, %c0_13, %c0_14] : memref<1x32x256xf32, #tpu.memory_space<vmem>>, vector<1x32x256xf32>
    %35 = vector.shape_cast %34 : vector<1x32x256xf32> to vector<32x256xf32>
    %36 = vector.shape_cast %33 : vector<32x256xf32> to vector<1x32x256xf32>
    tpu.vector_store %arg5[%c0_12, %c0_13, %c0_14], %36 {strides = array<i32>} : memref<1x32x256xf32, #tpu.memory_space<vmem>>, vector<1x32x256xf32>,
    %c0_15 = arith.constant 0 : index
    %c0_16 = arith.constant 0 : index
    %c0_17 = arith.constant 0 : index
    %37 = vector.load %arg6[%c0_15, %c0_16, %c0_17] : memref<1x32x256xf32, #tpu.memory_space<vmem>>, vector<1x32x256xf32>
    %38 = vector.shape_cast %37 : vector<1x32x256xf32> to vector<32x256xf32>
    %39 = vector.shape_cast %31 : vector<32x256xf32> to vector<1x32x256xf32>
    tpu.vector_store %arg6[%c0_15, %c0_16, %c0_17], %39 {strides = array<i32>} : memref<1x32x256xf32, #tpu.memory_space<vmem>>, vector<1x32x256xf32>,
    return
  }
  func.func @transform_0(%arg0: i32) -> (i32, i32, i32) {
    %c0_i32 = arith.constant 0 : i32
    %c0_i32_0 = arith.constant 0 : i32
    %c0_i32_1 = arith.constant 0 : i32
    return %arg0, %c0_i32, %c0_i32_0 : i32, i32, i32
  }
  func.func @transform_1(%arg0: i32) -> (i32, i32, i32) {
    %c0_i32 = arith.constant 0 : i32
    %c0_i32_0 = arith.constant 0 : i32
    %c0_i32_1 = arith.constant 0 : i32
    return %arg0, %c0_i32, %c0_i32_0 : i32, i32, i32
  }
  func.func @transform_2(%arg0: i32) -> (i32, i32) {
    %c0_i32 = arith.constant 0 : i32
    %c0_i32_0 = arith.constant 0 : i32
    %c0_i32_1 = arith.constant 0 : i32
    return %c0_i32, %c0_i32_0 : i32, i32
  }
  func.func @transform_3(%arg0: i32) -> (i32, i32) {
    %c0_i32 = arith.constant 0 : i32
    %c0_i32_0 = arith.constant 0 : i32
    %c0_i32_1 = arith.constant 0 : i32
    return %c0_i32, %c0_i32_0 : i32, i32
  }
  func.func @transform_4(%arg0: i32) -> (i32, i32, i32) {
    %c0_i32 = arith.constant 0 : i32
    %c0_i32_0 = arith.constant 0 : i32
    %c0_i32_1 = arith.constant 0 : i32
    return %arg0, %c0_i32, %c0_i32_0 : i32, i32, i32
  }
  func.func @transform_5(%arg0: i32) -> (i32, i32, i32) {
    %c0_i32 = arith.constant 0 : i32
    %c0_i32_0 = arith.constant 0 : i32
    %c0_i32_1 = arith.constant 0 : i32
    return %arg0, %c0_i32, %c0_i32_0 : i32, i32, i32
  }
}

</mosaic_0001>

<bundles_post_ra>
// kernel: convlstm_cell_pallas.1
= control target key start
LH: loop header
LB: loop body
LE: loop exit
PB: predicated region body
PF: predicated region fallthrough
CT: control target
= control target key end

     0   :  { %s1838_s18 = smov 0   ;;  %s3287_s0 = inlined_call_operand.vmem [shape: f32[2,324,256], index: 0, kind: input, shape index: {}]   ;;  %s3288_s1 = inlined_call_operand.vmem [shape: f32[2,32,256], index: 1, kind: input, shape index: {}]   ;;  %s3289_s2 = inlined_call_operand.vmem [shape: f32[128,324], index: 2, kind: input, shape index: {}]   ;;  %s3290_s3 = inlined_call_operand.vmem [shape: f32[128,1], index: 3, kind: input, shape index: {}]   ;;  %s3291_s4 = inlined_call_operand.vmem [shape: f32[2,32,256], index: 4, kind: output, shape index: {0}]   ;;  %s3292_s5 = inlined_call_operand.vmem [shape: f32[2,32,256], index: 5, kind: output, shape index: {1}]  }
   0x1 LB: > { %s1558_s19 = sadd.s32 4294967295, %s1805_s18   ;;  %p1562_p0 = scmp.ge.s32.totalorder %s1805_s18, 1  ;;  %s1805_s18 = sphi %s1838_s18, %s16_s18  }
   0x2   : > { %p200_p1 = scmp.lt.s32.totalorder %s1805_s18, 3 }
   0x4   : > { %p201_p2 = pnand %p1562_p0, %p200_p1 }
   0x6   : > { %204 = sbr.rel (%p201_p2) target bundleno = 400 (0x190), region = 36 }
   0xb   : > { %p238_p3 = scmp.lt.s32.totalorder %s1558_s19, 1  ;;  %v1807_v0 = vmov 0   ;;  %v396_v1 = vld [vmem:[%s3290_s3] sm:$0xff]  ;;  %vm541_vm0 = vcmask 1043456   ;;  %v1880_v20 = vld [vmem:[%s3289_s2 + $0x10] sm:$0xff]  ;;  %vm492_vm1 = vcmask 556032  }
   0xc   : > { %1668 = vset.pattern.permute.xlu0 %v1807_v0  ;;  %1669 = vset.pattern.permute.xlu1 %v1807_v0  ;;  %v1885_v21 = vld [vmem:[%s3289_s2 + $0xe8] sm:$0xff]  ;;  %v398_v28 = vld [vmem:[%s3290_s3 + $0x10] sm:$0xff]  ;;  %v1914_v34 = vld [vmem:[%s3289_s2 + $0x100] sm:$0xff] }
   0xd   : > { %s3422_s19 = smov (!%p238_p3, %s1558_s19), 1  ;;  %414 = vperm.xlu0 %1668, %v396_v1   ;;  %1670 = vset.pattern.permute.xlu2 %v1807_v0  ;;  %v397_v31 = vld [vmem:[%s3290_s3 + $0x8] sm:$0xff]  ;;  %v1930_v42 = vld [vmem:[%s3289_s2 + $0xc0] sm:$0xff]  ;;  %v399_v43 = vld [vmem:[%s3290_s3 + $0x18] sm:$0xff] }
   0xe   : > { %s1658_s22 = smul.u32 656, %s3422_s19  ;;  %424 = vperm.xlu1 %1669, %v398_v28   ;;  %v1909_v33 = vld [vmem:[%s3289_s2 + $0x28] sm:$0xff]  ;;  %v1939_v45 = vld [vmem:[%s3289_s2] sm:$0xff]  ;;  %v1950_v47 = vld [vmem:[%s3289_s2 + $0x118] sm:$0xff]  ;;  %s2710_s15 = sshll.u32 %s3422_s19, 6 }
   0xf   : > { %v1944_v46 = vld [vmem:[%s3289_s2 + $0x40] sm:$0xff]  ;;  %v402_v50 = vld [vmem:[%s3290_s3 + $0x30] sm:$0xff]  ;;  %v1972_v57 = vld [vmem:[%s3289_s2 + $0xd8] sm:$0xff]  ;;  %s3010_s21 = scalar_lea.vmem %s3292_s5, %s2710_s15  ;;  %s3111_s24 = scalar_lea.vmem %s3291_s4, %s2710_s15 }
  0x10   : > { %s1855_s25 = scalar_lea.vmem %s3287_s0, %s1658_s22  ;;  %v1980_v61 = vld [vmem:[%s3289_s2 + $0x18] sm:$0xff]  ;;  %v1991_v63 = vld [vmem:[%s3289_s2 + $0x130] sm:$0xff]  ;;  %v400_v1 = vld [vmem:[%s3290_s3 + $0x20] sm:$0xff] }
  0x11   : > { %v288_v2 = vld [vmem:[%s1855_s25 + $0xf0] sm:$0xff]  ;;  %v338_v3 = vld [vmem:[%s1855_s25 + $0x280] sm:$0xf]  ;;  %v321_v22 = vld [vmem:[%s1855_s25 + $0x1f8] sm:$0xff]  ;;  %434 = vperm.xlu2 %1670, %v400_v1  }
  0x12   : > { %v286_v4 = vld [vmem:[%s1855_s25 + $0xe0] sm:$0xff]  ;;  %1633 = vmatpush.msra.mxu1 %v288_v2  ;;  %1570 = vmatpush.msk.msra.mxu2 %vm541_vm0, %v338_v3  ;;  %v336_v5 = vld [vmem:[%s1855_s25 + $0x270] sm:$0xff]  ;;  %v319_v24 = vld [vmem:[%s1855_s25 + $0x1e8] sm:$0xff] }
  0x13   : > { %1649 = vmatpush.msk.msra.mxu3 %vm541_vm0, %v338_v3  ;;  %548 = vmatpush.msra.mxu0 %v288_v2  ;;  %v284_v6 = vld [vmem:[%s1855_s25 + $0xd0] sm:$0xff]  ;;  %v334_v7 = vld [vmem:[%s1855_s25 + $0x260] sm:$0xff]  ;;  %v289_v25 = vld [vmem:[%s1855_s25 + $0xf8] sm:$0xff] }
  0x14   : > { %1634 = vmatpush.msra.mxu1 %v286_v4  ;;  %686 = vmatpush.msra.mxu2 %v336_v5  ;;  %v282_v8 = vld [vmem:[%s1855_s25 + $0xc0] sm:$0xff]  ;;  %v332_v9 = vld [vmem:[%s1855_s25 + $0x250] sm:$0xff]  ;;  %v317_v27 = vld [vmem:[%s1855_s25 + $0x1d8] sm:$0xff] }
  0x15   : > { %1650 = vmatpush.msra.mxu3 %v336_v5  ;;  %549 = vmatpush.msra.mxu0 %v286_v4  ;;  %v280_v10 = vld [vmem:[%s1855_s25 + $0xb0] sm:$0xff]  ;;  %v330_v11 = vld [vmem:[%s1855_s25 + $0x240] sm:$0xff]  ;;  %v315_v30 = vld [vmem:[%s1855_s25 + $0x1c8] sm:$0xff] }
  0x16   : > { %1635 = vmatpush.msra.mxu1 %v284_v6  ;;  %687 = vmatpush.msra.mxu2 %v334_v7  ;;  %v278_v12 = vld [vmem:[%s1855_s25 + $0xa0] sm:$0xff]  ;;  %v328_v13 = vld [vmem:[%s1855_s25 + $0x230] sm:$0xff]  ;;  %v287_v36 = vld [vmem:[%s1855_s25 + $0xe8] sm:$0xff] }
  0x17   : > { %1651 = vmatpush.msra.mxu3 %v334_v7  ;;  %550 = vmatpush.msra.mxu0 %v284_v6  ;;  %v276_v14 = vld [vmem:[%s1855_s25 + $0x90] sm:$0xff]  ;;  %v326_v15 = vld [vmem:[%s1855_s25 + $0x220] sm:$0xff]  ;;  %v313_v37 = vld [vmem:[%s1855_s25 + $0x1b8] sm:$0xff] }
  0x18   : > { %1636 = vmatpush.msra.mxu1 %v282_v8  ;;  %688 = vmatpush.msra.mxu2 %v332_v9  ;;  %v274_v16 = vld [vmem:[%s1855_s25 + $0x80] sm:$0xff]  ;;  %v324_v17 = vld [vmem:[%s1855_s25 + $0x210] sm:$0xff]  ;;  %v285_v39 = vld [vmem:[%s1855_s25 + $0xd8] sm:$0xff] }
  0x19   : > { %1652 = vmatpush.msra.mxu3 %v332_v9  ;;  %551 = vmatpush.msra.mxu0 %v282_v8  ;;  %v272_v18 = vld [vmem:[%s1855_s25 + $0x70] sm:$0xff]  ;;  %v322_v19 = vld [vmem:[%s1855_s25 + $0x200] sm:$0xff]  ;;  %v311_v40 = vld [vmem:[%s1855_s25 + $0x1a8] sm:$0xff] }
  0x1a   : > { %1637 = vmatpush.msra.mxu1 %v280_v10  ;;  %689 = vmatpush.msra.mxu2 %v330_v11  ;;  %v270_v23 = vld [vmem:[%s1855_s25 + $0x60] sm:$0xff]  ;;  %v268_v26 = vld [vmem:[%s1855_s25 + $0x50] sm:$0xff]  ;;  %v339_v48 = vld [vmem:[%s1855_s25 + $0x288] sm:$0xf] }
  0x1b   : > { %1653 = vmatpush.msra.mxu3 %v330_v11  ;;  %552 = vmatpush.msra.mxu0 %v280_v10  ;;  %v266_v29 = vld [vmem:[%s1855_s25 + $0x40] sm:$0xff]  ;;  %v264_v32 = vld [vmem:[%s1855_s25 + $0x30] sm:$0xff]  ;;  %v337_v51 = vld [vmem:[%s1855_s25 + $0x278] sm:$0xff] }
  0x1c   : > { %1638 = vmatpush.msra.mxu1 %v278_v12  ;;  %690 = vmatpush.msra.mxu2 %v328_v13  ;;  %v262_v35 = vld [vmem:[%s1855_s25 + $0x20] sm:$0xff]  ;;  %v260_v38 = vld [vmem:[%s1855_s25 + $0x10] sm:$0xff]  ;;  %v283_v52 = vld [vmem:[%s1855_s25 + $0xc8] sm:$0xff] }
  0x1d   : > { %1654 = vmatpush.msra.mxu3 %v328_v13  ;;  %553 = vmatpush.msra.mxu0 %v278_v12  ;;  %v258_v41 = vld [vmem:[%s1855_s25] sm:$0xff]  ;;  %v320_v44 = vld [vmem:[%s1855_s25 + $0x1f0] sm:$0xff]  ;;  %v309_v54 = vld [vmem:[%s1855_s25 + $0x198] sm:$0xff] }
  0x1e   : > { %1639 = vmatpush.msra.mxu1 %v276_v14  ;;  %691 = vmatpush.msra.mxu2 %v326_v15  ;;  %v318_v49 = vld [vmem:[%s1855_s25 + $0x1e0] sm:$0xff]  ;;  %v316_v53 = vld [vmem:[%s1855_s25 + $0x1d0] sm:$0xff]  ;;  %v281_v55 = vld [vmem:[%s1855_s25 + $0xb8] sm:$0xff] }
  0x1f   : > { %1655 = vmatpush.msra.mxu3 %v326_v15  ;;  %554 = vmatpush.msra.mxu0 %v276_v14  ;;  %v335_v56 = vld [vmem:[%s1855_s25 + $0x268] sm:$0xff]  ;;  %v314_v59 = vld [vmem:[%s1855_s25 + $0x1c0] sm:$0xff]  ;;  %v1985_v62 = vld [vmem:[%s3289_s2 + $0x58] sm:$0xff] }
  0x20   : > { %1640 = vmatpush.msra.mxu1 %v274_v16  ;;  %692 = vmatpush.msra.mxu2 %v324_v17  ;;  %v307_v58 = vld [vmem:[%s1855_s25 + $0x188] sm:$0xff]  ;;  %v312_v0 = vld [vmem:[%s1855_s25 + $0x1b0] sm:$0xff]  ;;  %v403_v2 = vld [vmem:[%s3290_s3 + $0x38] sm:$0xff] }
  0x21   : > { %1656 = vmatpush.msra.mxu3 %v324_v17  ;;  %555 = vmatpush.msra.mxu0 %v274_v16  ;;  %v279_v60 = vld [vmem:[%s1855_s25 + $0xa8] sm:$0xff]  ;;  %v310_v4 = vld [vmem:[%s1855_s25 + $0x1a0] sm:$0xff]  ;;  %v277_v5 = vld [vmem:[%s1855_s25 + $0x98] sm:$0xff] }
  0x22   : > { %1641 = vmatpush.msra.mxu1 %v272_v18  ;;  %693 = vmatpush.msra.mxu2 %v322_v19  ;;  %v405_v3 = vld [vmem:[%s3290_s3 + $0x48] sm:$0xff]  ;;  %v305_v6 = vld [vmem:[%s1855_s25 + $0x178] sm:$0xff]  ;;  %v308_v7 = vld [vmem:[%s1855_s25 + $0x190] sm:$0xff] }
  0x23   : > { %1657 = vmatpush.msra.mxu3 %v322_v19  ;;  %1571 = vmatmul.msk.f32.vlgmr.msra.gmra.mxu2 %vm492_vm1, %v1880_v20  ;;  %v333_v8 = vld [vmem:[%s1855_s25 + $0x258] sm:$0xff]  ;;  %v2016_v9 = vld [vmem:[%s3289_s2 + $0xf0] sm:$0xff]  ;;  %v275_v10 = vld [vmem:[%s1855_s25 + $0x88] sm:$0xff] }
  0x24   : > { %1580 = vmatmul.msk.f32.vlgmr.msra.gmra.mxu3 %vm492_vm1, %v1885_v21  ;;  %808 = vmatpush.msrb.mxu2 %v321_v22  ;;  %v303_v11 = vld [vmem:[%s1855_s25 + $0x168] sm:$0xff]  ;;  %v306_v12 = vld [vmem:[%s1855_s25 + $0x180] sm:$0xff]  ;;  %v2024_v13 = vld [vmem:[%s3289_s2 + $0x30] sm:$0xff] }
  0x25   : > { %556 = vmatpush.msra.mxu0 %v272_v18  ;;  %1642 = vmatpush.msra.mxu1 %v270_v23  ;;  %v2029_v14 = vld [vmem:[%s3289_s2 + $0x70] sm:$0xff]  ;;  %v2035_v15 = vld [vmem:[%s3289_s2 + $0x148] sm:$0xff]  ;;  %v301_v16 = vld [vmem:[%s1855_s25 + $0x158] sm:$0xff] }
  0x26   : > { %809 = vmatpush.msrb.mxu2 %v319_v24  ;;  %743 = vmatpush.msrb.mxu3 %v289_v25  ;;  %v401_v17 = vld [vmem:[%s3290_s3 + $0x28] sm:$0xff]  ;;  %v406_v18 = vld [vmem:[%s3290_s3 + $0x50] sm:$0xff]  ;;  %v273_v19 = vld [vmem:[%s1855_s25 + $0x78] sm:$0xff] }
  0x27   : > { %557 = vmatpush.msra.mxu0 %v270_v23  ;;  %1643 = vmatpush.msra.mxu1 %v268_v26  ;;  %v331_v22 = vld [vmem:[%s1855_s25 + $0x248] sm:$0xff]  ;;  %v304_v23 = vld [vmem:[%s1855_s25 + $0x170] sm:$0xff]  ;;  %v297_v28 = vld [vmem:[%s1855_s25 + $0x138] sm:$0xff] }
  0x28   : > { %810 = vmatpush.msrb.mxu2 %v317_v27  ;;  %419 = vperm.xlu0 %1668, %v397_v31   ;;  %v299_v24 = vld [vmem:[%s1855_s25 + $0x148] sm:$0xff] }
  0x29   : > { %558 = vmatpush.msra.mxu0 %v268_v26  ;;  %1644 = vmatpush.msra.mxu1 %v266_v29  ;;  %v271_v25 = vld [vmem:[%s1855_s25 + $0x68] sm:$0xff]  ;;  %v329_v26 = vld [vmem:[%s1855_s25 + $0x238] sm:$0xff] }
  0x2a   : > { %811 = vmatpush.msrb.mxu2 %v315_v30  ;;  %744 = vmatpush.msrb.mxu3 %v287_v36  ;;  %v2058_v27 = vld [vmem:[%s3289_s2 + $0x108] sm:$0xff]  ;;  %v302_v30 = vld [vmem:[%s1855_s25 + $0x160] sm:$0xff]  ;;  %v300_v36 = vld [vmem:[%s1855_s25 + $0x150] sm:$0xff] }
  0x2b   : > { %559 = vmatpush.msra.mxu0 %v266_v29  ;;  %1645 = vmatpush.msra.mxu1 %v264_v32  ;;  %v269_v29 = vld [vmem:[%s1855_s25 + $0x58] sm:$0xff]  ;;  %v2066_v31 = vld [vmem:[%s3289_s2 + $0x48] sm:$0xff] }
  0x2c   : > { %1572 = vmatmul.msk.f32.gmra.mxu2 %vm492_vm1, %v1909_v33  ;;  %1581 = vmatmul.msk.f32.gmra.mxu3 %vm492_vm1, %v1914_v34  ;;  %v259_v1 = vld [vmem:[%s1855_s25 + $0x8] sm:$0xff] }
  0x2d   : > { %560 = vmatpush.msra.mxu0 %v264_v32  ;;  %1646 = vmatpush.msra.mxu1 %v262_v35  ;;  %v2071_v32 = vld [vmem:[%s3289_s2 + $0x88] sm:$0xff] }
  0x2e   : > { %812 = vmatpush.msrb.mxu2 %v313_v37  ;;  %745 = vmatpush.msrb.mxu3 %v285_v39  ;;  %v267_v37 = vld [vmem:[%s1855_s25 + $0x48] sm:$0xff]  ;;  %v408_v39 = vld [vmem:[%s3290_s3 + $0x60] sm:$0xff] }
  0x2f   : > { %561 = vmatpush.msra.mxu0 %v262_v35  ;;  %1647 = vmatpush.msra.mxu1 %v260_v38  ;;  %v2077_v35 = vld [vmem:[%s3289_s2 + $0x160] sm:$0xff] }
  0x30   : > { %813 = vmatpush.msrb.mxu2 %v311_v40  ;;  %429 = vperm.xlu1 %1669, %v399_v43   ;;  %v298_v40 = vld [vmem:[%s1855_s25 + $0x140] sm:$0xff]  ;;  %v295_v43 = vld [vmem:[%s1855_s25 + $0x128] sm:$0xff] }
  0x31   : > { %562 = vmatpush.msra.mxu0 %v260_v38  ;;  %1648 = vmatpush.msra.mxu1 %v258_v41  ;;  %v404_v38 = vld [vmem:[%s3290_s3 + $0x40] sm:$0xff] }
  0x32   : > { %588 = vmatmul.f32.vlgmr.msra.gmra.mxu1 %v1930_v42  ;;  %444 = vperm.xlu0 %1668, %v402_v50   ;;  %v263_v50 = vld [vmem:[%s1855_s25 + $0x28] sm:$0xff] }
  0x33   : > { %613 = vmatpush.msrb.mxu1 %v320_v44  ;;  %563 = vmatpush.msra.mxu0 %v258_v41  ;;  %v265_v41 = vld [vmem:[%s1855_s25 + $0x38] sm:$0xff]  ;;  %v327_v44 = vld [vmem:[%s1855_s25 + $0x228] sm:$0xff] }
  0x34   : > { %564 = vmatmul.f32.vlgmr.msra.gmra.mxu0 %v1939_v45  ;;  %1573 = vmatmul.msk.f32.gmra.mxu2 %vm492_vm1, %v1944_v46 }
  0x35   : > { %1582 = vmatmul.msk.f32.gmra.mxu3 %vm492_vm1, %v1950_v47  ;;  %1587 = vmatpush.msk.msrb.mxu0 %vm541_vm0, %v339_v48  ;;  %v296_v48 = vld [vmem:[%s1855_s25 + $0x130] sm:$0xff] }
  0x36   : > { %614 = vmatpush.msrb.mxu1 %v318_v49  ;;  %746 = vmatpush.msrb.mxu3 %v283_v52  ;;  %v2100_v49 = vld [vmem:[%s3289_s2 + $0x120] sm:$0xff]  ;;  %v409_v52 = vld [vmem:[%s3290_s3 + $0x68] sm:$0xff] }
  0x37   : > { %881 = vmatpush.msrb.mxu0 %v337_v51  ;;  %814 = vmatpush.msrb.mxu2 %v309_v54  ;;  %v293_v51 = vld [vmem:[%s1855_s25 + $0x118] sm:$0xff]  ;;  %v2115_v54 = vld [vmem:[%s3289_s2 + $0xa0] sm:$0xff] }
  0x38   : > { %615 = vmatpush.msrb.mxu1 %v316_v53  ;;  %747 = vmatpush.msrb.mxu3 %v281_v55  ;;  %v2110_v53 = vld [vmem:[%s3289_s2 + $0x60] sm:$0xff]  ;;  %v2121_v55 = vld [vmem:[%s3289_s2 + $0x178] sm:$0xff] }
  0x39   : > { %882 = vmatpush.msrb.mxu0 %v335_v56  ;;  %815 = vmatpush.msrb.mxu2 %v307_v58  ;;  %v294_v56 = vld [vmem:[%s1855_s25 + $0x120] sm:$0xff]  ;;  %v261_v58 = vld [vmem:[%s1855_s25 + $0x18] sm:$0xff] }
  0x3a   : > { %591 = vmatmul.f32.gmra.mxu1 %v1972_v57  ;;  %748 = vmatpush.msrb.mxu3 %v279_v60  ;;  %v291_v60 = vld [vmem:[%s1855_s25 + $0x108] sm:$0xff] }
  0x3b   : > { %616 = vmatpush.msrb.mxu1 %v314_v59  ;;  %449 = vperm.xlu1 %1669, %v403_v2   ;;  %v325_v59 = vld [vmem:[%s1855_s25 + $0x218] sm:$0xff] }
  0x3c   : > { %567 = vmatmul.f32.gmra.mxu0 %v1980_v61  ;;  %1574 = vmatmul.msk.f32.gmra.mxu2 %vm492_vm1, %v1985_v62  ;;  %v407_v2 = vld [vmem:[%s3290_s3 + $0x58] sm:$0xff] }
  0x3d   : > { %1583 = vmatmul.msk.f32.gmra.mxu3 %vm492_vm1, %v1991_v63  ;;  %617 = vmatpush.msrb.mxu1 %v312_v0  ;;  %v292_v0 = vld [vmem:[%s1855_s25 + $0x110] sm:$0xff] }
  0x3e   : > { %459 = vperm.xlu0 %1668, %v405_v3   ;;  %749 = vmatpush.msrb.mxu3 %v277_v5  ;;  %v323_v3 = vld [vmem:[%s1855_s25 + $0x208] sm:$0xff]  ;;  %v2142_v5 = vld [vmem:[%s3289_s2 + $0x138] sm:$0xff] }
  0x3f   : > { %618 = vmatpush.msrb.mxu1 %v310_v4  ;;  %816 = vmatpush.msrb.mxu2 %v305_v6  ;;  %v290_v4 = vld [vmem:[%s1855_s25 + $0x100] sm:$0xff]  ;;  %v411_v6 = vld [vmem:[%s3290_s3 + $0x78] sm:$0xff]  ;;  %s2743_s25 = scalar_lea.vmem %s3288_s1, %s2710_s15 }
  0x40   : > { %883 = vmatpush.msrb.mxu0 %v333_v8  ;;  %750 = vmatpush.msrb.mxu3 %v275_v10  ;;  %v2153_v8 = vld [vmem:[%s3289_s2 + $0xb8] sm:$0xff]  ;;  %v2162_v10 = vld [vmem:[%s3289_s2 + $0x150] sm:$0xff] }
  0x41   : > { %619 = vmatpush.msrb.mxu1 %v308_v7  ;;  %817 = vmatpush.msrb.mxu2 %v303_v11  ;;  %v363_v7 = vld [vmem:[%s3289_s2 + $0x78] sm:$0xff]  ;;  %v366_v11 = vld [vmem:[%s3289_s2 + $0x90] sm:$0xff] }
  0x42   : > { %594 = vmatmul.f32.gmra.mxu1 %v2016_v9  ;;  %439 = vperm.xlu2 %1670, %v401_v17   ;;  %v369_v17 = vld [vmem:[%s3289_s2 + $0xa8] sm:$0xff] }
  0x43   : > { %620 = vmatpush.msrb.mxu1 %v306_v12  ;;  %818 = vmatpush.msrb.mxu2 %v301_v16  ;;  %v2170_v12 = vld [vmem:[%s3289_s2 + $0xd0] sm:$0xff]  ;;  %v2182_v16 = vld [vmem:[%s3289_s2 + $0x168] sm:$0xff] }
  0x44   : > { %570 = vmatmul.f32.gmra.mxu0 %v2024_v13  ;;  %1575 = vmatmul.msk.f32.gmra.mxu2 %vm492_vm1, %v2029_v14 }
  0x45   : > { %1584 = vmatmul.msk.f32.gmra.mxu3 %vm492_vm1, %v2035_v15  ;;  %464 = vperm.xlu1 %1669, %v406_v18   ;;  %v349_v18 = vld [vmem:[%s3289_s2 + $0x8] sm:$0xff] }
  0x46   : > { %751 = vmatpush.msrb.mxu3 %v273_v19  ;;  %884 = vmatpush.msrb.mxu0 %v331_v22  ;;  %v355_v19 = vld [vmem:[%s3289_s2 + $0x38] sm:$0xff] }
  0x47   : > { %621 = vmatpush.msrb.mxu1 %v304_v23  ;;  %819 = vmatpush.msrb.mxu2 %v299_v24  ;;  %v373_v23 = vld [vmem:[%s3289_s2 + $0xc8] sm:$0xff] }
  0x48   : > { %752 = vmatpush.msrb.mxu3 %v271_v25  ;;  %885 = vmatpush.msrb.mxu0 %v329_v26  ;;  %v376_v26 = vld [vmem:[%s3289_s2 + $0xe0] sm:$0xff] }
  0x49   : > { %820 = vmatpush.msrb.mxu2 %v297_v28  ;;  %622 = vmatpush.msrb.mxu1 %v302_v30 }
  0x4a   : > { %597 = vmatmul.f32.gmra.mxu1 %v2058_v27  ;;  %753 = vmatpush.msrb.mxu3 %v269_v29 }
  0x4b   : > { %623 = vmatpush.msrb.mxu1 %v300_v36  ;;  %454 = vperm.xlu2 %1670, %v404_v38   ;;  %v382_v38 = vld [vmem:[%s3289_s2 + $0x110] sm:$0xff] }
  0x4c   : > { %573 = vmatmul.f32.gmra.mxu0 %v2066_v31  ;;  %1576 = vmatmul.msk.f32.gmra.mxu2 %vm492_vm1, %v2071_v32 }
  0x4d   : > { %1585 = vmatmul.msk.f32.gmra.mxu3 %vm492_vm1, %v2077_v35  ;;  %474 = vperm.xlu0 %1668, %v408_v39  }
  0x4e   : > { %754 = vmatpush.msrb.mxu3 %v267_v37  ;;  %624 = vmatpush.msrb.mxu1 %v298_v40 }
  0x4f   : > { %821 = vmatpush.msrb.mxu2 %v295_v43  ;;  %886 = vmatpush.msrb.mxu0 %v327_v44  ;;  %v385_v43 = vld [vmem:[%s3289_s2 + $0x128] sm:$0xff] }
  0x50   : > { %755 = vmatpush.msrb.mxu3 %v265_v41  ;;  %625 = vmatpush.msrb.mxu1 %v296_v48 }
  0x51   : > { %822 = vmatpush.msrb.mxu2 %v293_v51  ;;  %479 = vperm.xlu1 %1669, %v409_v52  }
  0x52   : > { %600 = vmatmul.f32.gmra.mxu1 %v2100_v49  ;;  %756 = vmatpush.msrb.mxu3 %v263_v50  ;;  %v388_v50 = vld [vmem:[%s3289_s2 + $0x140] sm:$0xff] }
  0x53   : > { %626 = vmatpush.msrb.mxu1 %v294_v56  ;;  %887 = vmatpush.msrb.mxu0 %v325_v59 }
  0x54   : > { %576 = vmatmul.f32.gmra.mxu0 %v2110_v53  ;;  %1577 = vmatmul.msk.f32.gmra.mxu2 %vm492_vm1, %v2115_v54 }
  0x55   : > { %1586 = vmatmul.msk.f32.gmra.mxu3 %vm492_vm1, %v2121_v55  ;;  %823 = vmatpush.msrb.mxu2 %v291_v60  ;;  %v394_v60 = vld [vmem:[%s3289_s2 + $0x170] sm:$0xff] }
  0x56   : > { %757 = vmatpush.msrb.mxu3 %v261_v58  ;;  %627 = vmatpush.msrb.mxu1 %v292_v0 }
  0x57   : > { %469 = vperm.xlu2 %1670, %v407_v2   ;;  %888 = vmatpush.msrb.mxu0 %v323_v3 }
  0x58   : > { %758 = vmatpush.msrb.mxu3 %v259_v1  ;;  %628 = vmatpush.msrb.mxu1 %v290_v4 }
  0x59   : > { %489 = vperm.xlu0 %1668, %v411_v6  }
  0x5a   : > { %603 = vmatmul.f32.gmra.mxu1 %v2142_v5 }
  0x5c   : > { %579 = vmatmul.f32.gmra.mxu0 %v363_v7  ;;  %1578 = vmatmul.msk.f32.gmra.mxu2 %vm492_vm1, %v2153_v8 }
  0x5d   : > { %759 = vmatmul.f32.vlgmr.msrb.gmra.mxu3 %v1939_v45  ;;  %v410_v45 = vld [vmem:[%s3290_s3 + $0x70] sm:$0xff] }
  0x5f   : > { %484 = vperm.xlu2 %1670, %v410_v45  }
  0x62   : > { %606 = vmatmul.f32.gmra.mxu1 %v2162_v10 }
  0x64   : > { %582 = vmatmul.f32.gmra.mxu0 %v366_v11  ;;  %1579 = vmatmul.msk.f32.gmra.mxu2 %vm492_vm1, %v2170_v12 }
  0x65   : > { %762 = vmatmul.f32.gmra.mxu3 %v1980_v61  ;;  %v352_v61 = vld [vmem:[%s3289_s2 + $0x20] sm:$0xff] }
  0x6a   : > { %609 = vmatmul.f32.gmra.mxu1 %v2182_v16 }
  0x6c   : > { %585 = vmatmul.f32.gmra.mxu0 %v369_v17  ;;  %824 = vmatmul.f32.vlgmr.msrb.gmra.mxu2 %v349_v18 }
  0x6d   : > { %765 = vmatmul.f32.gmra.mxu3 %v2024_v13  ;;  %v358_v13 = vld [vmem:[%s3289_s2 + $0x50] sm:$0xff] }
  0x72   : > { %629 = vmatmul.f32.vlgmr.msrb.gmra.mxu1 %v349_v18 }
  0x74   : > { %827 = vmatmul.f32.gmra.mxu2 %v352_v61  ;;  %1588 = vmatmul.msk.f32.vlgmr.msrb.gmra.mxu0 %vm492_vm1, %v1880_v20  ;;  %v361_v20 = vld [vmem:[%s3289_s2 + $0x68] sm:$0xff] }
  0x75   : > { %768 = vmatmul.f32.gmra.mxu3 %v2066_v31  ;;  %v379_v31 = vld [vmem:[%s3289_s2 + $0xf8] sm:$0xff] }
  0x7a   : > { %632 = vmatmul.f32.gmra.mxu1 %v352_v61 }
  0x7c   : > { %830 = vmatmul.f32.gmra.mxu2 %v355_v19  ;;  %1589 = vmatmul.msk.f32.gmra.mxu0 %vm492_vm1, %v1909_v33  ;;  %v364_v33 = vld [vmem:[%s3289_s2 + $0x80] sm:$0xff] }
  0x7d   : > { %771 = vmatmul.f32.gmra.mxu3 %v2110_v53 }
  0x82   : > { %635 = vmatmul.f32.gmra.mxu1 %v355_v19 }
  0x84   : > { %833 = vmatmul.f32.gmra.mxu2 %v358_v13  ;;  %1590 = vmatmul.msk.f32.gmra.mxu0 %vm492_vm1, %v1944_v46  ;;  %v367_v46 = vld [vmem:[%s3289_s2 + $0x98] sm:$0xff] }
  0x85   : > { %774 = vmatmul.f32.gmra.mxu3 %v363_v7 }
  0x8a   : > { %638 = vmatmul.f32.gmra.mxu1 %v358_v13 }
  0x8c   : > { %836 = vmatmul.f32.gmra.mxu2 %v361_v20  ;;  %1591 = vmatmul.msk.f32.gmra.mxu0 %vm492_vm1, %v1985_v62  ;;  %v370_v62 = vld [vmem:[%s3289_s2 + $0xb0] sm:$0xff] }
  0x8d   : > { %777 = vmatmul.f32.gmra.mxu3 %v366_v11 }
  0x92   : > { %641 = vmatmul.f32.gmra.mxu1 %v361_v20 }
  0x94   : > { %839 = vmatmul.f32.gmra.mxu2 %v364_v33  ;;  %1592 = vmatmul.msk.f32.gmra.mxu0 %vm492_vm1, %v2029_v14 }
  0x95   : > { %780 = vmatmul.f32.gmra.mxu3 %v369_v17 }
  0x9a   : > { %644 = vmatmul.f32.gmra.mxu1 %v364_v33 }
  0x9c   : > { %842 = vmatmul.f32.gmra.mxu2 %v367_v46  ;;  %1593 = vmatmul.msk.f32.gmra.mxu0 %vm492_vm1, %v2071_v32 }
  0x9d   : > { %783 = vmatmul.f32.gmra.mxu3 %v1930_v42 }
  0xa2   : > { %647 = vmatmul.f32.gmra.mxu1 %v367_v46 }
  0xa4   : > { %845 = vmatmul.f32.gmra.mxu2 %v370_v62  ;;  %1594 = vmatmul.msk.f32.gmra.mxu0 %vm492_vm1, %v2115_v54  ;;  %v391_v54 = vld [vmem:[%s3289_s2 + $0x158] sm:$0xff] }
  0xa5   : > { %786 = vmatmul.f32.gmra.mxu3 %v1972_v57 }
  0xa6   : > { %v2231_v14 = vpop.f32.mrf.mxu2 }
  0xa7   : > { %v2233_v22 = vpop.f32.mrf.mxu3 }
  0xaa   : > { %650 = vmatmul.f32.gmra.mxu1 %v370_v62 }
  0xac   : > { %848 = vmatmul.f32.gmra.mxu2 %v373_v23  ;;  %1595 = vmatmul.msk.f32.gmra.mxu0 %vm492_vm1, %v2153_v8 }
  0xad   : > { %789 = vmatmul.f32.gmra.mxu3 %v2016_v9 }
  0xaf   : > { %v2241_v42 = vpop.f32.mrf.mxu1  ;;  %v2243_v24 = vpop.f32.mrf.mxu2 }
  0xb0   : > { %v2245_v57 = vpop.f32.mrf.mxu3 }
  0xb1   : > { %v2247_v25 = vpop.f32.mrf.mxu0 }
  0xb2   : > { %653 = vmatmul.f32.gmra.mxu1 %v373_v23 }
  0xb4   : > { %851 = vmatmul.f32.gmra.mxu2 %v376_v26  ;;  %1596 = vmatmul.msk.f32.gmra.mxu0 %vm492_vm1, %v2170_v12 }
  0xb5   : > { %792 = vmatmul.f32.gmra.mxu3 %v2058_v27 }
  0xb7   : > { %v2255_v9 = vpop.f32.mrf.mxu1  ;;  %v2257_v28 = vpop.f32.mrf.mxu2 }
  0xb8   : > { %v2259_v29 = vpop.f32.mrf.mxu3 }
  0xb9   : > { %v2261_v30 = vpop.f32.mrf.mxu0 }
  0xba   : > { %656 = vmatmul.f32.gmra.mxu1 %v376_v26 }
  0xbc   : > { %854 = vmatmul.f32.gmra.mxu2 %v379_v31  ;;  %1597 = vmatmul.msk.f32.gmra.mxu0 %vm492_vm1, %v1885_v21 }
  0xbd   : > { %795 = vmatmul.f32.gmra.mxu3 %v2100_v49 }
  0xbf   : > { %v2269_v27 = vpop.f32.mrf.mxu1  ;;  %v2271_v32 = vpop.f32.mrf.mxu2 }
  0xc0   : > { %v2273_v36 = vpop.f32.mrf.mxu3 }
  0xc1   : > { %v2275_v37 = vpop.f32.mrf.mxu0 }
  0xc2   : > { %659 = vmatmul.f32.gmra.mxu1 %v379_v31 }
  0xc4   : > { %857 = vmatmul.f32.gmra.mxu2 %v382_v38  ;;  %1598 = vmatmul.msk.f32.gmra.mxu0 %vm492_vm1, %v1914_v34 }
  0xc5   : > { %798 = vmatmul.f32.gmra.mxu3 %v2142_v5  ;;  %v425_v5 = vpop.permute.xlu1 %424 }
  0xc7   : > { %v2283_v21 = vpop.f32.mrf.mxu1  ;;  %v2285_v39 = vpop.f32.mrf.mxu2 }
  0xc8   : > { %v2287_v40 = vpop.f32.mrf.mxu3 }
  0xc9   : > { %v2289_v41 = vpop.f32.mrf.mxu0 }
  0xca   : > { %662 = vmatmul.f32.gmra.mxu1 %v382_v38 }
  0xcc   : > { %860 = vmatmul.f32.gmra.mxu2 %v385_v43  ;;  %1599 = vmatmul.msk.f32.gmra.mxu0 %vm492_vm1, %v1950_v47 }
  0xcd   : > { %801 = vmatmul.f32.gmra.mxu3 %v2162_v10  ;;  %v2344_v10 = vpop.permute.xlu2 %434  ;;  %v430_v20 = vpop.permute.xlu1 %429 }
  0xcf   : > { %v2297_v34 = vpop.f32.mrf.mxu1  ;;  %v2299_v44 = vpop.f32.mrf.mxu2 }
  0xd0   : > { %v2301_v48 = vpop.f32.mrf.mxu3 }
  0xd1   : > { %3308 = vst [vmem:[#allocation2_spill] sm:$0xff] %v2301_v48  ;;  %v2303_v49 = vpop.f32.mrf.mxu0 }
  0xd2   : > { %665 = vmatmul.f32.gmra.mxu1 %v385_v43 }
  0xd4   : > { %863 = vmatmul.f32.gmra.mxu2 %v388_v50  ;;  %1600 = vmatmul.msk.f32.gmra.mxu0 %vm492_vm1, %v1991_v63 }
  0xd5   : > { %804 = vmatmul.f32.gmra.mxu3 %v2182_v16  ;;  %v2348_v26 = vpop.permute.xlu2 %439 }
  0xd7   : > { %v2311_v47 = vpop.f32.mrf.mxu1  ;;  %v2313_v51 = vpop.f32.mrf.mxu2 }
  0xd8   : > { %v2315_v52 = vpop.f32.mrf.mxu3 }
  0xd9   : > { %3309 = vst [vmem:[#allocation3_spill] sm:$0xff] %v2315_v52  ;;  %v2317_v53 = vpop.f32.mrf.mxu0 }
  0xda   : > { %668 = vmatmul.f32.gmra.mxu1 %v388_v50 }
  0xdc   : > { %866 = vmatmul.f32.gmra.mxu2 %v391_v54  ;;  %1601 = vmatmul.msk.f32.gmra.mxu0 %vm492_vm1, %v2035_v15  ;;  %v415_v15 = vpop.permute.xlu0 %414 }
  0xdd   : > { %v566_v6 = vadd.f32 %v2247_v25, %v415_v15 }
  0xdf   : > { %v2324_v63 = vpop.f32.mrf.mxu1  ;;  %v2326_v56 = vpop.f32.mrf.mxu2 }
  0xe0   : > { %v760_v58 = vpop.f32.mrf.mxu3 }
  0xe1   : > { %v2328_v59 = vpop.f32.mrf.mxu0  ;;  %v761_v4 = vadd.f32 %v760_v58, %v415_v15 }
  0xe2   : > { %671 = vmatmul.f32.gmra.mxu1 %v391_v54 }
  0xe4   : > { %869 = vmatmul.f32.gmra.mxu2 %v394_v60  ;;  %1602 = vmatmul.msk.f32.gmra.mxu0 %vm492_vm1, %v2077_v35  ;;  %v420_v16 = vpop.permute.xlu0 %419 }
  0xe5   : > { %v569_v19 = vadd.f32 %v2261_v30, %v420_v16 }
  0xe7   : > { %v2335_v0 = vpop.f32.mrf.mxu1  ;;  %v2337_v1 = vpop.f32.mrf.mxu2 }
  0xe8   : > { %v763_v2 = vpop.f32.mrf.mxu3 }
  0xe9   : > { %v2339_v3 = vpop.f32.mrf.mxu0  ;;  %v764_v18 = vadd.f32 %v763_v2, %v420_v16  ;;  %v575_v16 = vadd.f32 %v2289_v41, %v430_v20 }
  0xea   : > { %674 = vmatmul.f32.gmra.mxu1 %v394_v60 }
  0xec   : > { %1603 = vmatmul.msk.f32.gmra.mxu0 %vm492_vm1, %v2121_v55  ;;  %v2350_v43 = vpop.permute.xlu0 %444 }
  0xef   : > { %v630_v7 = vpop.f32.mrf.mxu1  ;;  %v825_v8 = vpop.f32.mrf.mxu2 }
  0xf0   : > { %v631_v35 = vadd.f32 %v630_v7, %v566_v6  ;;  %v766_v11 = vpop.f32.mrf.mxu3  ;;  %v826_v12 = vadd.f32 %v825_v8, %v761_v4  ;;  %v2354_v7 = vpop.permute.xlu1 %449 }
  0xf1   : > { %v890_v45 = vpop.f32.mrf.mxu0  ;;  %v767_v50 = vadd.f32 %v766_v11, %v425_v5 }
  0xf2   : > { %v891_v17 = vadd.f32 %v890_v45, %v826_v12  ;;  %v696_v61 = vadd.f32 %v2231_v14, %v631_v35  ;;  %v572_v14 = vadd.f32 %v2275_v37, %v425_v5  ;;  %v2356_v45 = vpop.permute.xlu2 %454 }
  0xf4   : > { %v1604_v23 = vmul.f32 -1.442695, %v696_v61  ;;  %v1605_v31 = vmul.f32 -1.442695, %v891_v17  ;;  %v2359_v5 = vpop.permute.xlu0 %459 }
  0xf6   : > { %1671 = vpow2.f32 %v1604_v23 }
  0xf7   : > { %v633_v13 = vpop.f32.mrf.mxu1  ;;  %v828_v55 = vpop.f32.mrf.mxu2  ;;  %1673 = vpow2.f32 %v1605_v31 }
  0xf8   : > { %v634_v33 = vadd.f32 %v633_v13, %v569_v19  ;;  %v769_v46 = vpop.f32.mrf.mxu3  ;;  %v829_v62 = vadd.f32 %v828_v55, %v764_v18 }
  0xf9   : > { %v893_v25 = vpop.f32.mrf.mxu0  ;;  %v770_v37 = vadd.f32 %v769_v46, %v430_v20  ;;  %v2368_v46 = vpop.permute.xlu1 %464 }
  0xfa   : > { %v894_v38 = vadd.f32 %v893_v25, %v829_v62  ;;  %v699_v54 = vadd.f32 %v2243_v24, %v634_v33  ;;  %v2370_v41 = vpop.permute.xlu2 %469 }
  0xfc   : > { %v1606_v60 = vmul.f32 -1.442695, %v699_v54  ;;  %v1672_v35 = vpop.eup %1671  ;;  %v1607_v24 = vmul.f32 -1.442695, %v894_v38  ;;  %v2374_v38 = vpop.permute.xlu0 %474 }
  0xfd   : > { %v1674_v12 = vpop.eup %1673  ;;  %v2362_v17 = vadd.f32 1.0, %v1672_v35 }
  0xfe   : > { %1675 = vpow2.f32 %v1606_v60  ;;  %v2364_v18 = vadd.f32 1.0, %v1674_v12 }
  0xff   : > { %v636_v30 = vpop.f32.mrf.mxu1  ;;  %v831_v58 = vpop.f32.mrf.mxu2  ;;  %1677 = vpow2.f32 %v1607_v24  ;;  %vm975_vm2 = vweird.f32 %v2362_v17 }
 0x100   : > { %v637_v15 = vadd.f32 %v636_v30, %v572_v14  ;;  %v772_v2 = vpop.f32.mrf.mxu3  ;;  %v832_v4 = vadd.f32 %v831_v58, %v767_v50  ;;  %1679 = vrcp.f32 %v2362_v17  ;;  %v578_v50 = vadd.f32 %v2303_v49, %v2344_v10 }
 0x101   : > { %v896_v6 = vpop.f32.mrf.mxu0  ;;  %1681 = vrcp.f32 %v2364_v18  ;;  %v773_v12 = vadd.f32 %v772_v2, %v2344_v10  ;;  %vm990_vm3 = vweird.f32 %v2364_v18 }
 0x102   : > { %v897_v8 = vadd.f32 %v896_v6, %v832_v4  ;;  %v702_v11 = vadd.f32 %v2257_v28, %v637_v15 }
 0x104   : > { %v1608_v13 = vmul.f32 -1.442695, %v702_v11  ;;  %v1676_v25 = vpop.eup %1675  ;;  %v1609_v58 = vmul.f32 -1.442695, %v897_v8  ;;  %v2391_v11 = vadd.f32 %v2241_v42, %v2356_v45 }
 0x105   : > { %v2372_v20 = vadd.f32 1.0, %v1676_v25  ;;  %v1678_v31 = vpop.eup %1677 }
 0x106   : > { %1683 = vpow2.f32 %v1608_v13  ;;  %v2378_v30 = vpop.eup %1679  ;;  %v2386_v35 = vadd.f32 1.0, %v1678_v31  ;;  %v2416_v13 = vadd.f32 %v2283_v21, %v2370_v41 }
 0x107   : > { %v639_v61 = vpop.f32.mrf.mxu1  ;;  %v834_v19 = vpop.f32.mrf.mxu2  ;;  %1685 = vrcp.f32 %v2372_v20  ;;  %vm976_vm4 = vweird.f32 %v2378_v30  ;;  %vm1005_vm8 = vweird.f32 %v2372_v20 }
 0x108   : > { %v640_v55 = vadd.f32 %v639_v61, %v575_v16  ;;  %v775_v33 = vpop.f32.mrf.mxu3  ;;  %v835_v62 = vadd.f32 %v834_v19, %v770_v37  ;;  %v2383_v6 = vpop.eup %1681  ;;  %v971_v61 = vmul.f32 %v2378_v30, %v2362_v17  ;;  %1687 = vpow2.f32 %v1609_v58  ;;  %vm2501_vm9 = vmor %vm975_vm2, %vm976_vm4 }
 0x109   : > { %v899_v23 = vpop.f32.mrf.mxu0  ;;  %v2398_v37 = vpop.permute.xlu1 %479  ;;  %v986_v10 = vmul.f32 %v2383_v6, %v2364_v18  ;;  %1689 = vrcp.f32 %v2386_v35  ;;  %vm991_vm6 = vweird.f32 %v2383_v6  ;;  %vm1020_vm13 = vweird.f32 %v2386_v35 }
 0x10a   : > { %v900_v28 = vadd.f32 %v899_v23, %v835_v62  ;;  %v705_v60 = vadd.f32 %v2271_v32, %v640_v55  ;;  %v2395_v32 = vadd.f32 %v2255_v9, %v2359_v5  ;;  %v2400_v16 = vpop.permute.xlu2 %484  ;;  %v776_v9 = vadd.f32 %v775_v33, %v2348_v26  ;;  %v2420_v62 = vpop.permute.xlu0 %489  ;;  %vm2513_vm10 = vmor %vm990_vm3, %vm991_vm6 }
 0x10b   : > { %v581_v55 = vadd.f32 %v2317_v53, %v2348_v26  ;;  %3310 = vst [vmem:[#allocation4_spill] sm:$0xff] %v2420_v62  ;;  %v2426_v33 = vadd.f32 %v2297_v34, %v2374_v38  ;;  %v2434_v21 = vadd.f32 %v2324_v63, %v2400_v16  ;;  %v584_v26 = vadd.f32 %v2328_v59, %v2350_v43 }
 0x10c   : > { %v1684_v49 = vpop.eup %1683  ;;  %v1610_v2 = vmul.f32 -1.442695, %v705_v60  ;;  %v1611_v23 = vmul.f32 -1.442695, %v900_v28  ;;  %v972_v28 = vsub.f32 1.0, %v971_v61  ;;  %v987_v34 = vsub.f32 1.0, %v986_v10 }
 0x10d   : > { %v2407_v42 = vadd.f32 1.0, %v1684_v49  ;;  %v2422_v25 = vpop.eup %1685  ;;  %v2443_v63 = vadd.f32 %v2335_v0, %v2420_v62  ;;  %v981_v59 = vand.u32 2147483648, %v2362_v17  ;;  %v996_v61 = vand.u32 2147483648, %v2364_v18 }
 0x10e   : > { %1691 = vpow2.f32 %v1610_v2  ;;  %v979_v0 = vand.u32 2147483647, %v2362_v17  ;;  %v994_v2 = vand.u32 2147483647, %v2364_v18  ;;  %vm1006_vm11 = vweird.f32 %v2422_v25 }
 0x10f   : > { %v642_v54 = vpop.f32.mrf.mxu1  ;;  %v837_v14 = vpop.f32.mrf.mxu2  ;;  %1693 = vrcp.f32 %v2407_v42  ;;  %3311 = vst [vmem:[#allocation5_spill] sm:$0xff] %v2443_v63  ;;  %v1024_v17 = vand.u32 2147483647, %v2386_v35  ;;  %vm2551_vm14 = vmor %vm1005_vm8, %vm1006_vm11  ;;  %vm1035_vm1 = vweird.f32 %v2407_v42 }
 0x110   : > { %v643_v15 = vadd.f32 %v642_v54, %v578_v50  ;;  %v2381_v4 = vpop.f32.mrf.mxu3  ;;  %v838_v19 = vadd.f32 %v837_v14, %v773_v12  ;;  %v1001_v12 = vmul.f32 %v2422_v25, %v2372_v20  ;;  %1695 = vpow2.f32 %v1611_v23 }
 0x111   : > { %v902_v24 = vpop.f32.mrf.mxu0  ;;  %vm2473_vm5 = vcmp.eq.f32.partialorder %v979_v0, 8.507059e+37  ;;  %vm2478_vm7 = vcmp.eq.f32.partialorder %v994_v2, 8.507059e+37  ;;  %vm2556_vm0 = vcmp.eq.f32.partialorder %v1024_v17, 8.507059e+37 }
 0x112   : > { %v708_v8 = vadd.f32 %v2285_v39, %v643_v15  ;;  %v2412_v39 = vadd.f32 %v2269_v27, %v2368_v46  ;;  %v2430_v27 = vadd.f32 %v2311_v47, %v2398_v37  ;;  %v903_v47 = vadd.f32 %v902_v24, %v838_v19  ;;  %v1688_v15 = vpop.eup %1687 }
 0x113   : > { %v2448_v49 = vpop.eup %1689  ;;  %v973_v19 = vmul.f32 %v2378_v30, %v972_v28  ;;  %v1002_v23 = vsub.f32 1.0, %v1001_v12 }
 0x114   : > { %v1612_v31 = vmul.f32 -1.442695, %v708_v8  ;;  %v2452_v8 = vadd.f32 %v2339_v3, %v2354_v7  ;;  %v1692_v3 = vpop.eup %1691  ;;  %vm1021_vm15 = vweird.f32 %v2448_v49 }
 0x115   : > { %v2487_v0 = vadd.f32 1.0, %v1692_v3  ;;  %v1003_v2 = vmul.f32 %v2422_v25, %v1002_v23  ;;  %v1011_v3 = vand.u32 2147483648, %v2372_v20  ;;  %vm2595_vm2 = vmor %vm1020_vm13, %vm1021_vm15 }
 0x116   : > { %1697 = vpow2.f32 %v1612_v31  ;;  %v2464_v31 = vadd.f32 1.0, %v1688_v15 }
 0x117   : > { %v645_v50 = vpop.f32.mrf.mxu1  ;;  %v840_v53 = vpop.f32.mrf.mxu2  ;;  %3316 = vst [vmem:[#allocation6_spill] sm:$0xff] %v2487_v0 }
 0x118   : > { %v646_v54 = vadd.f32 %v645_v50, %v581_v55  ;;  %v2438_v14 = vpop.f32.mrf.mxu3  ;;  %v841_v58 = vadd.f32 %v840_v53, %v776_v9  ;;  %v1613_v9 = vmul.f32 -1.442695, %v903_v47  ;;  %v988_v55 = vmul.f32 %v2383_v6, %v987_v34  ;;  %v2466_v53 = vpop.eup %1693 }
 0x119   : > { %v905_v60 = vpop.f32.mrf.mxu0  ;;  %v982_v50 = vor.u32 1.1754944e-38, %v981_v59  ;;  %v997_v34 = vor.u32 1.1754944e-38, %v996_v61  ;;  %v1009_v61 = vand.u32 2147483647, %v2372_v20  ;;  %vm1036_vm3 = vweird.f32 %v2466_v53 }
 0x11a   : > { %v711_v24 = vadd.f32 %v2299_v44, %v646_v54  ;;  %v906_v10 = vadd.f32 %v905_v60, %v841_v58  ;;  %v1016_v44 = vmul.f32 %v2448_v49, %v2386_v35  ;;  %v779_v54 = vadd.f32 %v2381_v4, %v2350_v43  ;;  %v1696_v60 = vpop.eup %1695  ;;  %vm2632_vm4 = vmor %vm1035_vm1, %vm1036_vm3 }
 0x11b   : > { %1699 = vpow2.f32 %v1613_v9  ;;  %v2492_v62 = vadd.f32 1.0, %v1696_v60  ;;  %vm2518_vm12 = vcmp.eq.f32.partialorder %v1009_v61, 8.507059e+37  ;;  %v782_v60 = vadd.f32 %v2438_v14, %v2354_v7 }
 0x11c   : > { %v1614_v47 = vmul.f32 -1.442695, %v711_v24  ;;  %v1615_v52 = vmul.f32 -1.442695, %v906_v10  ;;  %v1698_v43 = vpop.eup %1697  ;;  %v974_v24 = vadd.f32 %v2378_v30, %v973_v19  ;;  %v1017_v10 = vsub.f32 1.0, %v1016_v44 }
 0x11d   : > { %1701 = vrcp.f32 %v2464_v31  ;;  %3317 = vst [vmem:[#allocation7_spill] sm:$0xff] %v2492_v62  ;;  %v2494_v48 = vadd.f32 1.0, %v1698_v43  ;;  %v1026_v44 = vand.u32 2147483648, %v2386_v35 }
 0x11e   : > { %1703 = vpow2.f32 %v1614_v47  ;;  %v978_v23 = vsel %vm2501_vm9, %v2378_v30, %v974_v24  ;;  %v1004_v30 = vadd.f32 %v2422_v25, %v1003_v2 }
 0x11f   : > { %v648_v58 = vpop.f32.mrf.mxu1  ;;  %v843_v28 = vpop.f32.mrf.mxu2  ;;  %1705 = vpow2.f32 %v1615_v52  ;;  %v1027_v20 = vor.u32 1.1754944e-38, %v1026_v44  ;;  %vm1127_vm6 = vweird.f32 %v2494_v48 }
 0x120   : > { %v649_v12 = vadd.f32 %v648_v58, %v584_v26  ;;  %v2471_v63 = vpop.f32.mrf.mxu3  ;;  %v989_v26 = vadd.f32 %v2383_v6, %v988_v55  ;;  %v1031_v58 = vmul.f32 %v2466_v53, %v2407_v42  ;;  %v844_v9 = vadd.f32 %v843_v28, %v779_v54 }
 0x121   : > { %v908_v4 = vpop.f32.mrf.mxu0  ;;  %1707 = vrcp.f32 %v2487_v0  ;;  %v1018_v54 = vmul.f32 %v2448_v49, %v1017_v10  ;;  %v1700_v47 = vpop.eup %1699  ;;  %v1008_v59 = vsel %vm2551_vm14, %v2422_v25, %v1004_v30  ;;  %v1039_v30 = vand.u32 2147483647, %v2407_v42 }
 0x122   : > { %v714_v19 = vadd.f32 %v2313_v51, %v649_v12  ;;  %v993_v18 = vsel %vm2513_vm10, %v2383_v6, %v989_v26  ;;  %v1032_v28 = vsub.f32 1.0, %v1031_v58  ;;  %1709 = vrcp.f32 %v2492_v62 }
 0x123   : > { %v909_v12 = vadd.f32 %v908_v4, %v844_v9  ;;  %v2533_v61 = vpop.eup %1701  ;;  %1711 = vrcp.f32 %v2494_v48  ;;  %v1012_v26 = vor.u32 1.1754944e-38, %v1011_v3  ;;  %v2541_v58 = vsel %vm2473_vm5, %v982_v50, %v978_v23 }
 0x124   : > { %v1616_v55 = vmul.f32 -1.442695, %v714_v19  ;;  %v1704_v10 = vpop.eup %1703  ;;  %v2545_v7 = vsel %vm2478_vm7, %v997_v34, %v993_v18  ;;  %v2560_v15 = vadd.f32 1.0, %v1700_v47  ;;  %v1019_v3 = vadd.f32 %v2448_v49, %v1018_v54 }
 0x125   : > { %v1706_v50 = vpop.eup %1705  ;;  %v1617_v9 = vmul.f32 -1.442695, %v909_v12  ;;  %v1033_v23 = vmul.f32 %v2466_v53, %v1032_v28  ;;  %v2570_v17 = vadd.f32 1.0, %v1704_v10  ;;  %v2578_v25 = vmul.f32 %v2533_v61, %v2464_v31 }
 0x126   : > { %1713 = vpow2.f32 %v1616_v55  ;;  %v2580_v44 = vadd.f32 1.0, %v1706_v50  ;;  %v1041_v54 = vand.u32 2147483648, %v2407_v42  ;;  %v785_v12 = vadd.f32 %v2471_v63, %v2356_v45 }
 0x127   : > { %v651_v43 = vpop.f32.mrf.mxu1  ;;  %v846_v24 = vpop.f32.mrf.mxu2  ;;  %1715 = vrcp.f32 %v2560_v15  ;;  %v1023_v52 = vsel %vm2595_vm2, %v2448_v49, %v1019_v3  ;;  %v1034_v55 = vadd.f32 %v2466_v53, %v1033_v23  ;;  %v1047_v45 = vsub.f32 1.0, %v2578_v25 }
 0x128   : > { %v2536_v6 = vpop.f32.mrf.mxu3  ;;  %v652_v34 = vadd.f32 %v651_v43, %v2452_v8  ;;  %v847_v19 = vadd.f32 %v846_v24, %v782_v60  ;;  %v2568_v51 = vpop.eup %1707  ;;  %1717 = vpow2.f32 %v1617_v9  ;;  %vm2639_vm5 = vcmp.eq.f32.partialorder %v1039_v30, 8.507059e+37 }
 0x129   : > { %v911_v2 = vpop.f32.mrf.mxu0  ;;  %3328 = vst [vmem:[#allocation8_spill] sm:$0xff] %v2568_v51  ;;  %v2574_v8 = vpop.eup %1709  ;;  %v2608_v35 = vmul.f32 %v2568_v51, %v2487_v0  ;;  %1719 = vrcp.f32 %v2570_v17  ;;  %vm1142_vm10 = vweird.f32 %v2560_v15  ;;  %vm1157_vm11 = vweird.f32 %v2570_v17 }
 0x12a   : > { %v717_v18 = vadd.f32 %v2326_v56, %v652_v34  ;;  %3329 = vst [vmem:[#allocation9_spill] sm:$0xff] %v2574_v8  ;;  %v2584_v47 = vpop.eup %1711  ;;  %v912_v28 = vadd.f32 %v911_v2, %v847_v19  ;;  %v2589_v56 = vsel %vm2518_vm12, %v1012_v26, %v1008_v59  ;;  %v1133_v26 = vand.u32 2147483648, %v2494_v48 }
 0x12b   : > { %3332 = vst [vmem:[#allocation10_spill] sm:$0xff] %v2608_v35  ;;  %v2617_v63 = vmul.f32 %v2574_v8, %v2492_v62  ;;  %v1123_v49 = vmul.f32 %v2584_v47, %v2494_v48  ;;  %1721 = vrcp.f32 %v2580_v44  ;;  %v1148_v34 = vand.u32 2147483648, %v2560_v15 }
 0x12c   : > { %v1618_v10 = vmul.f32 -1.442695, %v717_v18  ;;  %v1714_v50 = vpop.eup %1713  ;;  %v1619_v59 = vmul.f32 -1.442695, %v912_v28  ;;  %v2626_v19 = vsel %vm2556_vm0, %v1027_v20, %v1023_v52  ;;  %v1038_v18 = vsel %vm2632_vm4, %v2466_v53, %v1034_v55 }
 0x12d   : > { %3333 = vst [vmem:[#allocation11_spill] sm:$0xff] %v2617_v63  ;;  %v2643_v4 = vpop.eup %1715  ;;  %v2646_v28 = vor.u32 1.1754944e-38, %v1133_v26  ;;  %v2654_v52 = vor.u32 1.1754944e-38, %v1148_v34  ;;  %v1131_v55 = vand.u32 2147483647, %v2494_v48  ;;  %vm1128_vm7 = vweird.f32 %v2584_v47 }
 0x12e   : > { %1723 = vpow2.f32 %v1618_v10  ;;  %v1718_v60 = vpop.eup %1717  ;;  %v788_v10 = vadd.f32 %v2536_v6, %v2359_v5  ;;  %vm1143_vm9 = vweird.f32 %v2643_v4  ;;  %vm2716_vm12 = vmor %vm1127_vm6, %vm1128_vm7  ;;  %vm1172_vm13 = vweird.f32 %v2580_v44 }
 0x12f   : > { %v654_v43 = vpop.f32.mrf.mxu1  ;;  %v849_v24 = vpop.f32.mrf.mxu2  ;;  %1725 = vpow2.f32 %v1619_v59  ;;  %v1163_v59 = vand.u32 2147483648, %v2570_v17  ;;  %v2667_v3 = vadd.f32 1.0, %v1718_v60  ;;  %vm2685_vm8 = vcmp.eq.f32.partialorder %v1131_v55, 8.507059e+37  ;;  %vm2778_vm1 = vmor %vm1142_vm10, %vm1143_vm9 }
 0x130   : > { %v2612_v2 = vpop.f32.mrf.mxu3  ;;  %v655_v9 = vadd.f32 %v654_v43, %v2391_v11  ;;  %v850_v23 = vadd.f32 %v849_v24, %v785_v12  ;;  %v1042_v11 = vor.u32 1.1754944e-38, %v1041_v54  ;;  %v1124_v43 = vsub.f32 1.0, %v1123_v49  ;;  %v2652_v30 = vpop.eup %1719 }
 0x131   : > { %v914_v14 = vpop.f32.mrf.mxu0  ;;  %v2650_v24 = vadd.f32 1.0, %v1714_v50  ;;  %v2657_v26 = vpop.eup %1721  ;;  %vm1158_vm14 = vweird.f32 %v2652_v30 }
 0x132   : > { %v720_v42 = vadd.f32 %v2337_v1, %v655_v9  ;;  %v915_v53 = vadd.f32 %v914_v14, %v850_v23  ;;  %v1138_v1 = vmul.f32 %v2643_v4, %v2560_v15  ;;  %v1178_v9 = vand.u32 2147483648, %v2580_v44  ;;  %vm2791_vm3 = vmor %vm1157_vm11, %vm1158_vm14 }
 0x133   : > { %v1125_v23 = vmul.f32 %v2584_v47, %v1124_v43  ;;  %v1168_v12 = vmul.f32 %v2657_v26, %v2580_v44  ;;  %v2680_v60 = vsel %vm2639_vm5, %v1042_v11, %v1038_v18  ;;  %v1048_v43 = vmul.f32 %v2533_v61, %v1047_v45 }
 0x134   : > { %v1620_v54 = vmul.f32 -1.442695, %v720_v42  ;;  %v1621_v49 = vmul.f32 -1.442695, %v915_v53  ;;  %v1153_v42 = vmul.f32 %v2652_v30, %v2570_v17  ;;  %v1724_v53 = vpop.eup %1723  ;;  %3338 = vst [vmem:[#allocation12_spill] sm:$0xff] %v2680_v60  ;;  %v2692_v25 = vor.u32 1.1754944e-38, %v1178_v9 }
 0x135   : > { %v1726_v62 = vpop.eup %1725  ;;  %v2695_v18 = vadd.f32 1.0, %v1724_v53  ;;  %vm1173_vm0 = vweird.f32 %v2657_v26 }
 0x136   : > { %1727 = vpow2.f32 %v1620_v54  ;;  %v1139_v54 = vsub.f32 1.0, %v1138_v1  ;;  %v1154_v45 = vsub.f32 1.0, %v1153_v42  ;;  %v1169_v1 = vsub.f32 1.0, %v1168_v12  ;;  %vm2811_vm5 = vmor %vm1172_vm13, %vm1173_vm0 }
 0x137   : > { %v657_v14 = vpop.f32.mrf.mxu1  ;;  %v852_v50 = vpop.f32.mrf.mxu2  ;;  %1729 = vrcp.f32 %v2650_v24  ;;  %v2705_v42 = vadd.f32 1.0, %v1726_v62 }
 0x138   : > { %v658_v5 = vadd.f32 %v657_v14, %v2395_v32  ;;  %1731 = vpow2.f32 %v1621_v49  ;;  %v2676_v20 = vpop.f32.mrf.mxu3  ;;  %v853_v32 = vadd.f32 %v852_v50, %v788_v10  ;;  %v2690_v49 = vor.u32 1.1754944e-38, %v1163_v59 }
 0x139   : > { %v917_v6 = vpop.f32.mrf.mxu0  ;;  %1733 = vrcp.f32 %v2667_v3  ;;  %v1161_v50 = vand.u32 2147483647, %v2570_v17  ;;  %v1176_v59 = vand.u32 2147483647, %v2580_v44  ;;  %3341 = vst [vmem:[#allocation13_spill] sm:$0xff] %v2705_v42 }
 0x13a   : > { %v723_v34 = vadd.f32 %v2233_v22, %v658_v5  ;;  %v1126_v22 = vadd.f32 %v2584_v47, %v1125_v23  ;;  %v918_v10 = vadd.f32 %v917_v6, %v853_v32  ;;  %v1140_v5 = vmul.f32 %v2643_v4, %v1139_v54 }
 0x13b   : > { %v2725_v54 = vadd.f32 %v2533_v61, %v1048_v43  ;;  %v1155_v32 = vmul.f32 %v2652_v30, %v1154_v45  ;;  %vm2783_vm2 = vcmp.eq.f32.partialorder %v1161_v50, 8.507059e+37  ;;  %vm2801_vm4 = vcmp.eq.f32.partialorder %v1176_v59, 8.507059e+37 }
 0x13c   : > { %v1622_v11 = vmul.f32 -1.442695, %v723_v34  ;;  %v1728_v55 = vpop.eup %1727  ;;  %v791_v34 = vadd.f32 %v2612_v2, %v2368_v46  ;;  %v1623_v46 = vmul.f32 -1.442695, %v918_v10  ;;  %v1141_v6 = vadd.f32 %v2643_v4, %v1140_v5 }
 0x13d   : > { %v2701_v9 = vpop.eup %1729  ;;  %v2721_v62 = vadd.f32 1.0, %v1728_v55  ;;  %v1170_v55 = vmul.f32 %v2657_v26, %v1169_v1 }
 0x13e   : > { %1735 = vpow2.f32 %v1622_v11  ;;  %v1732_v12 = vpop.eup %1731  ;;  %v1130_v11 = vsel %vm2716_vm12, %v2584_v47, %v1126_v22  ;;  %v1183_v43 = vmul.f32 %v2701_v9, %v2650_v24  ;;  %v1193_v47 = vand.u32 2147483648, %v2650_v24 }
 0x13f   : > { %v660_v23 = vpop.f32.mrf.mxu1  ;;  %v855_v53 = vpop.f32.mrf.mxu2  ;;  %1737 = vrcp.f32 %v2695_v18  ;;  %v2736_v10 = vadd.f32 1.0, %v1732_v12  ;;  %v3344_v22 = vand.u32 2147483647, %v2560_v15  ;;  %v1135_v12 = vsel %vm2685_vm8, %v2646_v28, %v1130_v11 }
 0x140   : > { %v661_v2 = vadd.f32 %v660_v23, %v2412_v39  ;;  %v2733_v8 = vpop.eup %1733  ;;  %1739 = vpow2.f32 %v1623_v46  ;;  %v856_v45 = vadd.f32 %v855_v53, %v791_v34  ;;  %v2757_v23 = vpop.f32.mrf.mxu3  ;;  %v1171_v14 = vadd.f32 %v2657_v26, %v1170_v55 }
 0x141   : > { %v920_v48 = vpop.f32.mrf.mxu0  ;;  %1741 = vrcp.f32 %v2705_v42  ;;  %vm2751_vm15 = vcmp.eq.f32.partialorder %v3344_v22, 8.507059e+37  ;;  %v1198_v34 = vmul.f32 %v2733_v8, %v2667_v3  ;;  %v1156_v22 = vadd.f32 %v2652_v30, %v1155_v32 }
 0x142   : > { %v726_v39 = vadd.f32 %v2245_v57, %v661_v2  ;;  %v1208_v57 = vand.u32 2147483648, %v2667_v3  ;;  %1743 = vrcp.f32 %v2721_v62  ;;  %v340_v2 = vld [vmem:[%s2743_s25] sm:$0xff]  ;;  %v921_v0 = vadd.f32 %v920_v48, %v856_v45 }
 0x143   : > { %1745 = vrcp.f32 %v2736_v10  ;;  %v1184_v11 = vsub.f32 1.0, %v1183_v43  ;;  %v1223_v32 = vand.u32 2147483648, %v2695_v18  ;;  %v2795_v45 = vor.u32 1.1754944e-38, %v1193_v47 }
 0x144   : > { %v1736_v46 = vpop.eup %1735  ;;  %v1624_v53 = vmul.f32 -1.442695, %v726_v39  ;;  %v2797_v43 = vor.u32 1.1754944e-38, %v1208_v57  ;;  %v1199_v47 = vsub.f32 1.0, %v1198_v34  ;;  %v1145_v59 = vsel %vm2778_vm1, %v2643_v4, %v1141_v6 }
 0x145   : > { %v2769_v63 = vadd.f32 1.0, %v1736_v46  ;;  %v2772_v28 = vpop.eup %1737  ;;  %v1625_v44 = vmul.f32 -1.442695, %v921_v0  ;;  %v1175_v34 = vsel %vm2811_vm5, %v2657_v26, %v1171_v14  ;;  %v1185_v4 = vmul.f32 %v2701_v9, %v1184_v11  ;;  %v341_v0 = vld [vmem:[%s2743_s25 + $0x8] sm:$0xff]  ;;  %v342_v11 = vld [vmem:[%s2743_s25 + $0x10] sm:$0xff] }
 0x146   : > { %1747 = vpow2.f32 %v1624_v53  ;;  %v1740_v55 = vpop.eup %1739  ;;  %3353 = vst [vmem:[#allocation14_spill] sm:$0xff] %v2797_v43  ;;  %v2799_v53 = vmul.f32 %v1135_v12, %v340_v2  ;;  %v1160_v12 = vsel %vm2791_vm3, %v2652_v30, %v1156_v22  ;;  %v2833_v6 = vor.u32 1.1754944e-38, %v1223_v32  ;;  %v343_v32 = vld [vmem:[%s2743_s25 + $0x18] sm:$0xff] }
 0x147   : > { %v663_v39 = vpop.f32.mrf.mxu1  ;;  %v858_v46 = vpop.f32.mrf.mxu2  ;;  %v2815_v35 = vadd.f32 1.0, %v1740_v55  ;;  %1749 = vrcp.f32 %v2769_v63  ;;  %v794_v30 = vadd.f32 %v2676_v20, %v2370_v41  ;;  %v1150_v26 = vsel %vm2751_vm15, %v2654_v52, %v1145_v59 }
 0x148   : > { %v2805_v51 = vpop.eup %1741  ;;  %v664_v43 = vadd.f32 %v663_v39, %v2416_v13  ;;  %3359 = vst [vmem:[#allocation16_spill] sm:$0xff] %v2833_v6  ;;  %v1213_v13 = vmul.f32 %v2772_v28, %v2695_v18  ;;  %v1165_v14 = vsel %vm2783_vm2, %v2690_v49, %v1160_v12  ;;  %v1285_v20 = vand.u32 2147483648, %v2721_v62  ;;  %v799_v15 = vpop.f32.mrf.mxu3 }
 0x149   : > { %3356 = vst [vmem:[#allocation15_spill] sm:$0xff] %v2805_v51  ;;  %v923_v57 = vpop.f32.mrf.mxu0  ;;  %v2823_v2 = vpop.eup %1743  ;;  %1751 = vrcp.f32 %v2815_v35  ;;  %v1180_v39 = vsel %vm2801_vm4, %v2692_v25, %v1175_v34  ;;  %v2857_v1 = vmul.f32 %v2733_v8, %v1199_v47  ;;  %v1228_v52 = vmul.f32 %v2805_v51, %v2705_v42 }
 0x14a   : > { %v2830_v55 = vpop.eup %1745  ;;  %v1275_v41 = vmul.f32 %v2823_v2, %v2721_v62  ;;  %1753 = vpow2.f32 %v1625_v44  ;;  %v729_v48 = vadd.f32 %v2259_v29, %v664_v43  ;;  %v859_v12 = vadd.f32 %v858_v46, %v794_v30 }
 0x14b   : > { %v1290_v49 = vmul.f32 %v2830_v55, %v2736_v10  ;;  %v2867_v25 = vmul.f32 %v1150_v26, %v341_v0  ;;  %v1214_v34 = vsub.f32 1.0, %v1213_v13  ;;  %v1283_v22 = vand.u32 2147483647, %v2721_v62 }
 0x14c   : > { %v1748_v5 = vpop.eup %1747  ;;  %v2872_v6 = vmul.f32 %v1165_v14, %v342_v11  ;;  %v2874_v60 = vmul.f32 %v1180_v39, %v343_v32  ;;  %v1276_v29 = vsub.f32 1.0, %v1275_v41  ;;  %v2876_v43 = vor.u32 1.1754944e-38, %v1285_v20 }
 0x14d   : > { %v2865_v59 = vadd.f32 1.0, %v1748_v5  ;;  %v2869_v47 = vpop.eup %1749  ;;  %v1300_v5 = vand.u32 2147483648, %v2736_v10  ;;  %v797_v46 = vadd.f32 %v2757_v23, %v2374_v38  ;;  %v1229_v26 = vsub.f32 1.0, %v1228_v52 }
 0x14e   : > { %v1291_v17 = vsub.f32 1.0, %v1290_v49  ;;  %v1626_v13 = vmul.f32 -1.442695, %v729_v48  ;;  %vm1279_vm6 = vweird.f32 %v2721_v62  ;;  %v1305_v41 = vmul.f32 %v2869_v47, %v2769_v63 }
 0x14f   : > { %v666_v44 = vpop.f32.mrf.mxu1  ;;  %v861_v50 = vpop.f32.mrf.mxu2  ;;  %1755 = vrcp.f32 %v2865_v59  ;;  %v924_v38 = vadd.f32 %v923_v57, %v859_v12  ;;  %v2891_v23 = vmul.f32 %v2772_v28, %v1214_v34  ;;  %v1298_v11 = vand.u32 2147483647, %v2736_v10 }
 0x150   : > { %v2881_v0 = vpop.eup %1751  ;;  %v667_v42 = vadd.f32 %v666_v44, %v2426_v33  ;;  %1757 = vpow2.f32 %v1626_v13  ;;  %v1277_v33 = vmul.f32 %v2823_v2, %v1276_v29  ;;  %vm1294_vm7 = vweird.f32 %v2736_v10 }
 0x151   : > { %v926_v30 = vpop.f32.mrf.mxu0  ;;  %v1754_v14 = vpop.eup %1753  ;;  %v1320_v20 = vmul.f32 %v2881_v0, %v2815_v35  ;;  %3360 = vst [vmem:[#allocation17_spill] sm:$0xff] %v2891_v23  ;;  %v2900_v52 = vadd.f32 %v2701_v9, %v1185_v4  ;;  %v2903_v49 = vmul.f32 %v2805_v51, %v1229_v26  ;;  %vm1280_vm8 = vweird.f32 %v2823_v2 }
 0x152   : > { %v2894_v32 = vadd.f32 1.0, %v1754_v14  ;;  %v732_v39 = vadd.f32 %v2273_v36, %v667_v42  ;;  %v1292_v57 = vmul.f32 %v2830_v55, %v1291_v17  ;;  %v2907_v48 = vor.u32 1.1754944e-38, %v1300_v5  ;;  %vm2938_vm14 = vmor %vm1279_vm6, %vm1280_vm8 }
 0x153   : > { %3361 = vst [vmem:[#allocation18_spill] sm:$0xff] %v2903_v49  ;;  %v1306_v12 = vsub.f32 1.0, %v1305_v41  ;;  %v1315_v44 = vand.u32 2147483648, %v2769_v63  ;;  %v1321_v34 = vsub.f32 1.0, %v1320_v20  ;;  %v1627_v29 = vmul.f32 -1.442695, %v924_v38  ;;  %v802_v41 = vpop.f32.mrf.mxu3 }
 0x154   : > { %vm2910_vm9 = vcmp.eq.f32.partialorder %v1283_v22, 8.507059e+37  ;;  %vm2914_vm10 = vcmp.eq.f32.partialorder %v1298_v11, 8.507059e+37  ;;  %vm1309_vm11 = vweird.f32 %v2769_v63  ;;  %v1313_v4 = vand.u32 2147483647, %v2769_v63 }
 0x155   : > { %1759 = vrcp.f32 %v2894_v32  ;;  %v800_v17 = vadd.f32 %v799_v15, %v2398_v37  ;;  %v2922_v5 = vpop.eup %1755  ;;  %v1278_v26 = vadd.f32 %v2823_v2, %v1277_v33  ;;  %vm1295_vm12 = vweird.f32 %v2830_v55 }
 0x156   : > { %v1328_v22 = vand.u32 2147483647, %v2815_v35  ;;  %1761 = vtanh.f32 %v732_v39  ;;  %v1758_v20 = vpop.eup %1757  ;;  %v1293_v38 = vadd.f32 %v2830_v55, %v1292_v57  ;;  %v862_v11 = vadd.f32 %v861_v50, %v797_v46  ;;  %vm2954_vm0 = vmor %vm1294_vm7, %vm1295_vm12 }
 0x157   : > { %v669_v13 = vpop.f32.mrf.mxu1  ;;  %v864_v14 = vpop.f32.mrf.mxu2  ;;  %vm1188_vm13 = vweird.f32 %v2701_v9  ;;  %v1307_v37 = vmul.f32 %v2869_v47, %v1306_v12  ;;  %v2931_v15 = vor.u32 1.1754944e-38, %v1315_v44  ;;  %v1322_v33 = vmul.f32 %v2881_v0, %v1321_v34 }
 0x158   : > { %v670_v49 = vadd.f32 %v669_v13, %v2430_v27  ;;  %v865_v23 = vadd.f32 %v864_v14, %v800_v17  ;;  %1763 = vpow2.f32 %v1627_v29  ;;  %v1330_v27 = vand.u32 2147483648, %v2815_v35 }
 0x159   : > { %v929_v51 = vpop.f32.mrf.mxu0  ;;  %v1335_v50 = vmul.f32 %v2922_v5, %v2865_v59  ;;  %v927_v46 = vadd.f32 %v926_v30, %v862_v11  ;;  %vm1187_vm15 = vweird.f32 %v2650_v24  ;;  %v1282_v12 = vsel %vm2938_vm14, %v2823_v2, %v1278_v26 }
 0x15a   : > { %v735_v57 = vadd.f32 %v2287_v40, %v670_v49  ;;  %vm1310_vm1 = vweird.f32 %v2869_v47  ;;  %vm2959_vm2 = vcmp.eq.f32.partialorder %v1313_v4, 8.507059e+37  ;;  %vm1324_vm3 = vweird.f32 %v2815_v35 }
 0x15b   : > { %v2964_v40 = vadd.f32 1.0, %v1758_v20  ;;  %v2966_v49 = vpop.eup %1759  ;;  %v1297_v10 = vsel %vm2954_vm0, %v2830_v55, %v1293_v38  ;;  %vm2971_vm4 = vcmp.eq.f32.partialorder %v1328_v22, 8.507059e+37  ;;  %v1345_v44 = vand.u32 2147483648, %v2865_v59  ;;  %vm2999_vm14 = vmor %vm1309_vm11, %vm1310_vm1 }
 0x15c   : > { %1765 = vtanh.f32 %v927_v46  ;;  %v930_v34 = vadd.f32 %v929_v51, %v865_v23  ;;  %vm1051_vm5 = vweird.f32 %v2533_v61  ;;  %v1762_v29 = vpop.eup %1761  ;;  %vm1203_vm6 = vweird.f32 %v2733_v8  ;;  %vm3050_vm0 = vmor %vm1187_vm15, %vm1188_vm13 }
 0x15d   : > { %v1308_v13 = vadd.f32 %v2869_v47, %v1307_v37  ;;  %v1323_v14 = vadd.f32 %v2881_v0, %v1322_v33  ;;  %vm1325_vm7 = vweird.f32 %v2881_v0  ;;  %1767 = vtanh.f32 %v735_v57 }
 0x15e   : > { %v1331_v4 = vor.u32 1.1754944e-38, %v1330_v27  ;;  %v1336_v17 = vsub.f32 1.0, %v1335_v50  ;;  %v1343_v26 = vand.u32 2147483647, %v2865_v59  ;;  %v1410_v51 = vmul.f32 %v1762_v29, %v2541_v58  ;;  %v1764_v23 = vpop.eup %1763  ;;  %v805_v50 = vpop.f32.mrf.mxu3  ;;  %v3384_v29 = vld [vmem:[#allocation4_spill] sm:$0xff] }
 0x15f   : > { %v672_v55 = vpop.f32.mrf.mxu1  ;;  %vm1050_vm8 = vweird.f32 %v2464_v31  ;;  %vm1202_vm12 = vweird.f32 %v2667_v3  ;;  %v2988_v22 = vsel %vm2910_vm9, %v2876_v43, %v1282_v12  ;;  %v2993_v20 = vsel %vm2914_vm10, %v2907_v48, %v1297_v10  ;;  %v867_v63 = vpop.f32.mrf.mxu2  ;;  %vm3022_vm10 = vmor %vm1324_vm3, %vm1325_vm7 }
 0x160   : > { %v1350_v38 = vmul.f32 %v2966_v49, %v2894_v32  ;;  %1769 = vrcp.f32 %v2964_v40  ;;  %v3376_v43 = vand.u32 2147483647, %v2650_v24  ;;  %vm1339_vm11 = vweird.f32 %v2865_v59  ;;  %vm3098_vm3 = vmor %vm1202_vm12, %vm1203_vm6 }
 0x161   : > { %v1418_v42 = vadd.f32 %v1410_v51, %v2799_v53  ;;  %v803_v11 = vadd.f32 %v802_v41, %v2400_v16  ;;  %1771 = vtanh.f32 %v930_v34  ;;  %v673_v37 = vadd.f32 %v672_v55, %v2434_v21  ;;  %v932_v10 = vpop.f32.mrf.mxu0 }
 0x162   : > { %vm3014_vm9 = vcmp.eq.f32.partialorder %v3376_v43, 8.507059e+37  ;;  %v1312_v33 = vsel %vm2999_vm14, %v2869_v47, %v1308_v13  ;;  %v1327_v35 = vsel %vm3022_vm10, %v2881_v0, %v1323_v14  ;;  %v3036_v39 = vor.u32 1.1754944e-38, %v1345_v44  ;;  %v1766_v46 = vpop.eup %1765  ;;  %v3381_v0 = vld [vmem:[#allocation2_spill] sm:$0xff] }
 0x163   : > { %v1358_v27 = vand.u32 2147483647, %v2894_v32  ;;  %v1337_v53 = vmul.f32 %v2922_v5, %v1336_v17  ;;  %v3040_v16 = vadd.f32 1.0, %v1764_v23  ;;  %1773 = vtanh.f32 %v1418_v42  ;;  %1450 = vst [vmem:[%s3010_s21] sm:$0xff] %v1418_v42  ;;  %v1768_v41 = vpop.eup %1767  ;;  %v344_v23 = vld [vmem:[%s2743_s25 + $0x20] sm:$0xff] }
 0x164   : > { %v868_v21 = vadd.f32 %v867_v63, %v803_v11  ;;  %v1351_v57 = vsub.f32 1.0, %v1350_v38  ;;  %v1360_v47 = vand.u32 2147483648, %v2894_v32  ;;  %v1411_v12 = vmul.f32 %v1766_v46, %v2545_v7 }
 0x165   : > { %v738_v62 = vadd.f32 %v3381_v0, %v673_v37  ;;  %v3057_v34 = vsel %vm2959_vm2, %v2931_v15, %v1312_v33  ;;  %vm1340_vm1 = vweird.f32 %v2922_v5  ;;  %v1412_v7 = vmul.f32 %v1768_v41, %v2589_v56  ;;  %vm3089_vm2 = vmor %vm1050_vm8, %vm1051_vm5  ;;  %v3393_v37 = vld [vmem:[#allocation15_spill] sm:$0xff]  ;;  %v3397_v41 = vld [vmem:[#allocation10_spill] sm:$0xff] }
 0x166   : > { %v3062_v13 = vadd.f32 %v805_v50, %v3384_v29  ;;  %v3064_v14 = vpop.eup %1769  ;;  %vm1218_vm13 = vweird.f32 %v2772_v28  ;;  %v3069_v24 = vsel %vm2971_vm4, %v1331_v4, %v1327_v35  ;;  %v1419_v30 = vadd.f32 %v1411_v12, %v2867_v25  ;;  %vm3125_vm6 = vmor %vm1339_vm11, %vm1340_vm1  ;;  %v3399_v12 = vld [vmem:[#allocation8_spill] sm:$0xff]  ;;  %v345_v29 = vld [vmem:[%s2743_s25 + $0x28] sm:$0xff] }
 0x167   : > { %v1190_v15 = vsel %vm3050_vm0, %v2701_v9, %v2900_v52  ;;  %1775 = vtanh.f32 %v738_v62  ;;  %v1772_v56 = vpop.eup %1771  ;;  %v3077_v55 = vadd.f32 %v2922_v5, %v1337_v53  ;;  %v1420_v2 = vadd.f32 %v1412_v7, %v2872_v6  ;;  %v3396_v53 = vld [vmem:[#allocation14_spill] sm:$0xff] }
 0x168   : > { %1777 = vrcp.f32 %v3040_v16  ;;  %v933_v4 = vadd.f32 %v932_v10, %v868_v21  ;;  %vm1217_vm15 = vweird.f32 %v2695_v18  ;;  %v1352_v25 = vmul.f32 %v2966_v49, %v1351_v57  ;;  %1451 = vst [vmem:[%s3010_s21 + $0x8] sm:$0xff] %v1419_v30  ;;  %v3400_v10 = vld [vmem:[#allocation13_spill] sm:$0xff] }
 0x169   : > { %1779 = vtanh.f32 %v1419_v30  ;;  %v1413_v9 = vmul.f32 %v1772_v56, %v2626_v19  ;;  %v1056_v6 = vand.u32 2147483648, %v2464_v31  ;;  %v1774_v17 = vpop.eup %1773  ;;  %vm3102_vm4 = vcmp.eq.f32.partialorder %v1343_v26, 8.507059e+37  ;;  %1452 = vst [vmem:[%s3010_s21 + $0x10] sm:$0xff] %v1420_v2  ;;  %v3401_v30 = vld [vmem:[#allocation3_spill] sm:$0xff]  ;;  %vm3176_vm0 = vmor %vm1217_vm15, %vm1218_vm13 }
 0x16a   : > { %vm1355_vm5 = vweird.f32 %v2966_v49  ;;  %1781 = vtanh.f32 %v1420_v2  ;;  %v1195_v58 = vsel %vm3014_vm9, %v2795_v45, %v1190_v15  ;;  %v1054_v26 = vand.u32 2147483647, %v2464_v31  ;;  %v3402_v2 = vld [vmem:[#allocation6_spill] sm:$0xff] }
 0x16b   : > { %v1201_v38 = vadd.f32 %v2733_v8, %v2857_v1  ;;  %v3131_v63 = vmul.f32 %v3064_v14, %v2964_v40  ;;  %v1434_v45 = vmul.f32 %v1774_v17, %v2988_v22  ;;  %v1421_v48 = vadd.f32 %v1413_v9, %v2874_v60  ;;  %v675_v1 = vpop.f32.mrf.mxu1  ;;  %v3405_v9 = vld [vmem:[#allocation17_spill] sm:$0xff]  ;;  %v870_v17 = vpop.f32.mrf.mxu2 }
 0x16c   : > { %v1206_v31 = vand.u32 2147483647, %v2667_v3  ;;  %v1342_v59 = vsel %vm3125_vm6, %v2922_v5, %v3077_v55  ;;  %vm1354_vm7 = vweird.f32 %v2894_v32  ;;  %v1053_v36 = vsel %vm3089_vm2, %v2533_v61, %v2725_v54  ;;  %v3394_v61 = vld [vmem:[#allocation12_spill] sm:$0xff] }
 0x16d   : > { %v1205_v60 = vsel %vm3098_vm3, %v2733_v8, %v1201_v38  ;;  %1783 = vtanh.f32 %v933_v4  ;;  %v1776_v22 = vpop.eup %1775  ;;  %v3149_v3 = vadd.f32 %v2966_v49, %v1352_v25  ;;  %1442 = vst [vmem:[%s3111_s24] sm:$0xff] %v1434_v45  ;;  %v1406_v42 = vmul.f32 %v1195_v58, %v344_v23  ;;  %v3395_v8 = vld [vmem:[#allocation5_spill] sm:$0xff]  ;;  %vm3209_vm13 = vmor %vm1354_vm7, %vm1355_vm5 }
 0x16e   : > { %1785 = vtanh.f32 %v1421_v48  ;;  %v1057_v5 = vor.u32 1.1754944e-38, %v1056_v6  ;;  %v3152_v11 = vpop.eup %1777  ;;  %vm1233_vm8 = vweird.f32 %v3393_v37  ;;  %1453 = vst [vmem:[%s3010_s21 + $0x18] sm:$0xff] %v1421_v48  ;;  %v1414_v54 = vmul.f32 %v1776_v22, %v3394_v61  ;;  %v346_v22 = vld [vmem:[%s2743_s25 + $0x30] sm:$0xff] }
 0x16f   : > { %vm1055_vm12 = vcmp.eq.f32.partialorder %v1054_v26, 8.507059e+37  ;;  %vm1207_vm14 = vcmp.eq.f32.partialorder %v1206_v31, 8.507059e+37  ;;  %v676_v33 = vadd.f32 %v675_v1, %v3395_v8  ;;  %v1780_v35 = vpop.eup %1779  ;;  %v1366_v50 = vsub.f32 1.0, %v3131_v63  ;;  %v935_v63 = vpop.f32.mrf.mxu0  ;;  %v3410_v31 = vld [vmem:[#allocation11_spill] sm:$0xff] }
 0x170   : > { %v1058_v46 = vsel %vm1055_vm12, %v1057_v5, %v1053_v36  ;;  %v1210_v21 = vsel %vm1207_vm14, %v3396_v53, %v1205_v60  ;;  %v3398_v57 = vsub.f32 1.0, %v3397_v41  ;;  %v1782_v62 = vpop.eup %1781  ;;  %vm1232_vm9 = vweird.f32 %v3400_v10  ;;  %v3417_v41 = vld [vmem:[#allocation7_spill] sm:$0xff] }
 0x171   : > { %v1435_v44 = vmul.f32 %v1780_v35, %v2993_v20  ;;  %v1422_v7 = vadd.f32 %v1414_v54, %v1406_v42  ;;  %v741_v15 = vadd.f32 %v3401_v30, %v676_v33  ;;  %vm1066_vm10 = vweird.f32 %v3399_v12  ;;  %v3413_v42 = vld [vmem:[#allocation16_spill] sm:$0xff] }
 0x172   : > { %v1063_v0 = vmul.f32 %v3399_v12, %v3398_v57  ;;  %v1436_v56 = vmul.f32 %v1782_v62, %v3057_v34  ;;  %vm1065_vm11 = vweird.f32 %v3402_v2  ;;  %v1069_v4 = vand.u32 2147483647, %v3402_v2 }
 0x173   : > { %v1784_v25 = vpop.eup %1783  ;;  %1443 = vst [vmem:[%s3111_s24 + $0x8] sm:$0xff] %v1435_v44  ;;  %1787 = vtanh.f32 %v1422_v7  ;;  %v1071_v34 = vand.u32 2147483648, %v3402_v2  ;;  %v1216_v52 = vadd.f32 %v2772_v28, %v3405_v9  ;;  %v1221_v6 = vand.u32 2147483647, %v2695_v18  ;;  %vm3193_vm1 = vmor %vm1065_vm11, %vm1066_vm10 }
 0x174   : > { %v1064_v55 = vadd.f32 %v3399_v12, %v1063_v0  ;;  %v1786_v51 = vpop.eup %1785  ;;  %v1347_v23 = vsel %vm3102_vm4, %v3036_v39, %v1342_v59  ;;  %1444 = vst [vmem:[%s3111_s24 + $0x10] sm:$0xff] %v1436_v56  ;;  %v1407_v58 = vmul.f32 %v1210_v21, %v345_v29  ;;  %v1415_v26 = vmul.f32 %v1784_v25, %v1058_v46  ;;  %v3412_v59 = vld [vmem:[#allocation9_spill] sm:$0xff]  ;;  %vm3237_vm4 = vmor %vm1232_vm9, %vm1233_vm8 }
 0x175   : > { %1789 = vtanh.f32 %v741_v15  ;;  %v1437_v18 = vmul.f32 %v1786_v51, %v3069_v24  ;;  %1454 = vst [vmem:[%s3010_s21 + $0x20] sm:$0xff] %v1422_v7  ;;  %v1072_v19 = vor.u32 1.1754944e-38, %v1071_v34  ;;  %v1220_v43 = vsel %vm3176_vm0, %v2772_v28, %v1216_v52  ;;  %v347_v56 = vld [vmem:[%s2743_s25 + $0x38] sm:$0xff] }
 0x176   : > { %v1068_v39 = vsel %vm3193_vm1, %v3399_v12, %v1064_v55  ;;  %v1423_v24 = vadd.f32 %v1415_v26, %v1407_v58  ;;  %vm1222_vm15 = vcmp.eq.f32.partialorder %v1221_v6, 8.507059e+37  ;;  %v871_v48 = vadd.f32 %v870_v17, %v3062_v13 }
 0x177   : > { %v3411_v1 = vsub.f32 1.0, %v3410_v31  ;;  %v1357_v28 = vsel %vm3209_vm13, %v2966_v49, %v3149_v3  ;;  %v1367_v60 = vmul.f32 %v3064_v14, %v1366_v50  ;;  %1445 = vst [vmem:[%s3111_s24 + $0x18] sm:$0xff] %v1437_v18  ;;  %vm1070_vm2 = vcmp.eq.f32.partialorder %v1069_v4, 8.507059e+37  ;;  %v3414_v49 = vld [vmem:[#allocation18_spill] sm:$0xff] }
 0x178   : > { %v1225_v5 = vsel %vm1222_vm15, %v3413_v42, %v1220_v43  ;;  %v1380_v61 = vmul.f32 %v3152_v11, %v3040_v16  ;;  %1791 = vtanh.f32 %v1423_v24  ;;  %1455 = vst [vmem:[%s3010_s21 + $0x28] sm:$0xff] %v1423_v24  ;;  %v1073_v13 = vsel %vm1070_vm2, %v1072_v19, %v1068_v39 }
 0x179   : > { %v1078_v36 = vmul.f32 %v3412_v59, %v3411_v1  ;;  %v936_v54 = vadd.f32 %v935_v63, %v871_v48  ;;  %v1788_v8 = vpop.eup %1787  ;;  %vm1081_vm3 = vweird.f32 %v3412_v59  ;;  %v1231_v3 = vadd.f32 %v3393_v37, %v3414_v49 }
 0x17a   : > { %v1236_v35 = vand.u32 2147483647, %v3400_v10  ;;  %v1438_v53 = vmul.f32 %v1788_v8, %v1347_v23  ;;  %v1408_v21 = vmul.f32 %v1225_v5, %v346_v22  ;;  %v1086_v57 = vand.u32 2147483648, %v3417_v41 }
 0x17b   : > { %v1079_v33 = vadd.f32 %v3412_v59, %v1078_v36  ;;  %v1790_v50 = vpop.eup %1789  ;;  %1793 = vtanh.f32 %v936_v54  ;;  %vm1080_vm5 = vweird.f32 %v3417_v41  ;;  %v1084_v0 = vand.u32 2147483647, %v3417_v41 }
 0x17c   : > { %v1416_v12 = vmul.f32 %v1790_v50, %v1073_v13  ;;  %v1235_v62 = vsel %vm3237_vm4, %v3393_v37, %v1231_v3  ;;  %v3418_v44 = vand.u32 2147483648, %v3400_v10  ;;  %vm1359_vm6 = vcmp.eq.f32.partialorder %v1358_v27, 8.507059e+37  ;;  %1446 = vst [vmem:[%s3111_s24 + $0x20] sm:$0xff] %v1438_v53  ;;  %vm3256_vm7 = vmor %vm1080_vm5, %vm1081_vm3 }
 0x17d   : > { %v1361_v29 = vor.u32 1.1754944e-38, %v1360_v47  ;;  %v1381_v30 = vsub.f32 1.0, %v1380_v61  ;;  %vm1370_vm8 = vweird.f32 %v3064_v14  ;;  %v1083_v10 = vsel %vm3256_vm7, %v3412_v59, %v1079_v33 }
 0x17e   : > { %v1239_v7 = vor.u32 1.1754944e-38, %v3418_v44  ;;  %v1424_v37 = vadd.f32 %v1416_v12, %v1408_v21  ;;  %vm1237_vm12 = vcmp.eq.f32.partialorder %v1236_v35, 8.507059e+37  ;;  %v1792_v27 = vpop.eup %1791  ;;  %v1368_v47 = vadd.f32 %v3064_v14, %v1367_v60 }
 0x17f   : > { %v1362_v32 = vsel %vm1359_vm6, %v1361_v29, %v1357_v28  ;;  %v1087_v55 = vor.u32 1.1754944e-38, %v1086_v57  ;;  %v1375_v4 = vand.u32 2147483648, %v2964_v40  ;;  %vm1085_vm14 = vcmp.eq.f32.partialorder %v1084_v0, 8.507059e+37 }
 0x180   : > { %v1240_v2 = vsel %vm1237_vm12, %v1239_v7, %v1235_v62  ;;  %v1439_v25 = vmul.f32 %v1792_v27, %v1362_v32  ;;  %1795 = vtanh.f32 %v1424_v37  ;;  %1456 = vst [vmem:[%s3010_s21 + $0x30] sm:$0xff] %v1424_v37  ;;  %vm1369_vm9 = vweird.f32 %v2964_v40 }
 0x181   : > { %v1794_v20 = vpop.eup %1793  ;;  %v1373_v34 = vand.u32 2147483647, %v2964_v40  ;;  %v1382_v9 = vmul.f32 %v3152_v11, %v1381_v30  ;;  %v1088_v52 = vsel %vm1085_vm14, %v1087_v55, %v1083_v10  ;;  %vm1371_vm10 = vmor %vm1369_vm9, %vm1370_vm8  ;;  %v1409_v6 = vmul.f32 %v1240_v2, %v347_v56 }
 0x182   : > { %1447 = vst [vmem:[%s3111_s24 + $0x28] sm:$0xff] %v1439_v25  ;;  %v1417_v17 = vmul.f32 %v1794_v20, %v1088_v52  ;;  %v1372_v51 = vsel %vm1371_vm10, %v3064_v14, %v1368_v47  ;;  %v1376_v23 = vor.u32 1.1754944e-38, %v1375_v4  ;;  %vm1385_vm0 = vweird.f32 %v3152_v11 }
 0x183   : > { %vm1374_vm11 = vcmp.eq.f32.partialorder %v1373_v34, 8.507059e+37  ;;  %v1383_v26 = vadd.f32 %v3152_v11, %v1382_v9  ;;  %v1390_v18 = vand.u32 2147483648, %v3040_v16  ;;  %vm1384_vm1 = vweird.f32 %v3040_v16 }
 0x184   : > { %v1425_v58 = vadd.f32 %v1417_v17, %v1409_v6  ;;  %v1377_v38 = vsel %vm1374_vm11, %v1376_v23, %v1372_v51  ;;  %v1388_v39 = vand.u32 2147483647, %v3040_v16  ;;  %vm1386_vm13 = vmor %vm1384_vm1, %vm1385_vm0 }
 0x185   : > { %v1387_v19 = vsel %vm1386_vm13, %v3152_v11, %v1383_v26  ;;  %v1391_v43 = vor.u32 1.1754944e-38, %v1390_v18 }
 0x186   : > { %v1796_v40 = vpop.eup %1795  ;;  %1797 = vtanh.f32 %v1425_v58  ;;  %1457 = vst [vmem:[%s3010_s21 + $0x38] sm:$0xff] %v1425_v58  ;;  %vm1389_vm15 = vcmp.eq.f32.partialorder %v1388_v39, 8.507059e+37 }
 0x187   : > { %v1440_v14 = vmul.f32 %v1796_v40, %v1377_v38  ;;  %v1392_v45 = vsel %vm1389_vm15, %v1391_v43, %v1387_v19 }
 0x189   : > { %1448 = vst [vmem:[%s3111_s24 + $0x30] sm:$0xff] %v1440_v14 }
 0x18c   : > { %v1798_v63 = vpop.eup %1797 }
 0x18d   : > { %v1441_v24 = vmul.f32 %v1798_v63, %v1392_v45 }
 0x18f   : > { %1449 = vst [vmem:[%s3111_s24 + $0x38] sm:$0xff] %v1441_v24 }
 0x190 PF: > { %s16_s18 = sadd.s32 1, %s1805_s18  }
 0x191   : > { %p13_p4 = scmp.ge.s32.totalorder %s16_s18, 4  }
 0x193   :  { %15 = sbr.rel (!%p13_p4) target bundleno = 1 (0x1), region = 81 }

</bundles_post_ra>
